<compile_context>
chip_gen: v7x
topology: tpu7x:2x2x1
jax: 0.10.0
libtpu: 0.0.40
codegen_flags: <defaults>
</compile_context>

<pallas_src>
import jax
import jax.numpy as jnp
from jax import lax
from jax.experimental import pallas as pl
from jax.experimental.pallas import tpu as pltpu

EPS = 1e-6          # GeM eps
NUM_HEADS = 5       # len(self.list_heads)


def _make_head_kernel(S, tS, grid_s, p_int, lane_acc):
    """Build the fused GeM + stacked-heads kernel for a given tiling."""
    need_mask = (S % tS) != 0
    rem = S - (grid_s - 1) * tS          # valid lanes in the last S tile (static)

    def _pow(x, p):
        if p_int is not None:            # frozen integer p -> VPU-only multiplies
            y = x
            for _ in range(p_int - 1):
                y = y * x
            return y
        return jnp.exp(p * jnp.log(x))   # generic runtime p (2 EUP pushes / elem)

    def _reduce(xv):
        if lane_acc:                     # keep hot loop on VPU: sum 128-lane slices
            part = xv[..., 0:128]
            for k in range(1, tS // 128):
                part = part + xv[..., k * 128:(k + 1) * 128]
            return part                  # (tB, tC, 128)
        return jnp.sum(xv, axis=-1)      # (tB, tC) -- single-tile case only

    def kernel(p_ref, feat_ref, w_ref, out_ref, acc_ref):
        # p_ref    : SMEM (1,)              GeM exponent (learned scalar)
        # feat_ref : VMEM (tB, tC, tS)      feature tile, reduction over lane axis
        # w_ref    : VMEM (tC, 5K)          stacked head weights (C slice)
        # out_ref  : VMEM (1, tB, 1, 5K)    partial concatenated head logits
        # acc_ref  : VMEM (tB, tC[,128])    running sum of clamp(x,eps)^p
        s = pl.program_id(2)
        ns = pl.num_programs(2)

        @pl.when(s == 0)
        def _init():
            acc_ref[...] = jnp.zeros_like(acc_ref)

        p = p_ref[0]
        # TODO(synk): F.dropout(p=0.5) is training-only -> identity at inference.
        x = jnp.maximum(feat_ref[...].astype(jnp.float32), EPS)   # clamp(min=eps)
        xp = _pow(x, p)                                           # x ** p

        if need_mask:
            # Only the last S tile has padded lanes; pay the mask only there.
            @pl.when(s != ns - 1)
            def _acc_plain():
                acc_ref[...] += _reduce(xp)

            @pl.when(s == ns - 1)
            def _acc_masked():
                lane = lax.broadcasted_iota(jnp.int32, xp.shape, 2)
                acc_ref[...] += _reduce(jnp.where(lane < rem, xp, 0.0))
        else:
            acc_ref[...] += _reduce(xp)

        @pl.when(s == ns - 1)
        def _finalize():
            inv_p = jnp.float32(1.0 / p_int) if p_int is not None else 1.0 / p
            inv_s = jnp.float32(1.0 / S)
            sums = jnp.sum(acc_ref[...], axis=-1) if lane_acc else acc_ref[...]
            # mean over HxW, then ^(1/p); sums >= (#valid)*eps^p > 0 so log is safe.
            pooled = jnp.exp(jnp.log(sums * inv_s) * inv_p)        # (tB, tC)
            # All 5 heads in one MXU push: (tB, tC) @ (tC, 5K); bias added outside.
            logits = jnp.dot(pooled, w_ref[...],
                             preferred_element_type=jnp.float32)   # (tB, 5K)
            out_ref[...] = logits[None, :, None, :]                # (1, tB, 1, 5K)

    return kernel


def timm_classifier_v2_head(feat_nchw, head_w, head_b, gem_p, *, max_tile_s=None):
    """Fused GeM pooling + 5 stacked 'simple' heads (eval / is_test path).

    feat_nchw: (B, C, H, W) f32/bf16 feature map (encoded_outputs[0])
    head_w:    (5, C, K)    per-head Linear weights (in x out layout)
    head_b:    (5, K)       per-head Linear biases
    gem_p:     (1,)         learned GeM exponent (init 3.0)
    max_tile_s: test hook forcing a smaller S tile (multiple of 128).
    """
    B, C, H, W = feat_nchw.shape
    K = head_w.shape[-1]
    KH = NUM_HEADS * K
    S = H * W
    bytes_per = jnp.dtype(feat_nchw.dtype).itemsize

    # Free, contiguous reshape: no NCHW->NHWC transpose of the big tensor.
    feat = feat_nchw.reshape(B, C, S)

    # Stack the 5 heads into a single (C, 5K) MXU operand (tiny tensors).
    w_cat = jnp.transpose(head_w, (1, 0, 2)).reshape(C, KH).astype(jnp.float32)
    b_cat = head_b.reshape(1, KH).astype(jnp.float32)
    p_arr = jnp.asarray(gem_p).reshape(1).astype(jnp.float32)

    # Host-side dispatch: frozen integer p (the common p=3) -> multiply-only path.
    p_int = None
    try:
        p_val = float(jnp.asarray(gem_p).reshape(-1)[0])
        if abs(p_val - round(p_val)) < 1e-6 and 1 <= round(p_val) <= 8:
            p_int = int(round(p_val))
    except Exception:            # traced (under jit) -> generic exp/log path
        p_int = None

    # --- C split: use both TensorCores for single-sample inference.
    if B == 1 and C >= 256 and (C // 2) % 8 == 0:
        tC = C // 2
    else:
        tC = C
    grid_c = C // tC

    # --- S tiling: size against VMEM so the feature double-buffer stays
    # ~<= 16 MiB per batch row (safe on v7x's 64 MiB, large enough to bury the
    # ~0.35us/step pipeline overhead).  tS is a multiple of 128 or the full S.
    FEAT_BUDGET = 16 * 1024 * 1024
    tS_cap = FEAT_BUDGET // (2 * tC * bytes_per)
    tS_cap = max(128, min(4096, (tS_cap // 128) * 128))
    if max_tile_s is not None:
        tS_cap = max(128, min(tS_cap, (max_tile_s // 128) * 128))
    if S <= tS_cap:
        tS, grid_s = S, 1
    else:
        tS, grid_s = tS_cap, pl.cdiv(S, tS_cap)
    lane_acc = grid_s > 1        # lane-wide accumulator (tS % 128 == 0 then)

    # --- Batch tiling: when S fits a single tile, amortize per-step overhead
    # over several batch rows and give the finalize matmul M = tB.
    if grid_s == 1:
        tB = min(B, 8)
        while tB > 1 and 2 * tB * tC * tS * bytes_per > 2 * FEAT_BUDGET:
            tB //= 2
    else:
        tB = 1
    grid_b = pl.cdiv(B, tB)

    acc_shape = (tB, tC, 128) if lane_acc else (tB, tC)
    feat_vmem = 2 * tB * tC * tS * bytes_per
    acc_vmem = 4 * tB * tC * (128 if lane_acc else 1)
    aux_vmem = 2 * 4 * (tC * 128 + tB * 128)     # padded W / out double-buffers
    vmem_limit = int(max(16 << 20,
                         min(48 << 20, feat_vmem + acc_vmem + aux_vmem + (8 << 20))))

    elem = B * C * S
    cost = pl.CostEstimate(
        flops=int(4 * elem + 2 * B * C * KH),
        transcendentals=int((0 if p_int is not None else 2 * elem) + 2 * B * C),
        bytes_accessed=int(elem * bytes_per + grid_b * C * KH * 4 + grid_c * B * KH * 4),
    )

    kernel = _make_head_kernel(S, tS, grid_s, p_int, lane_acc)

    partials = pl.pallas_call(
        kernel,
        out_shape=jax.ShapeDtypeStruct((grid_c, B, 1, KH), jnp.float32),
        grid_spec=pltpu.PrefetchScalarGridSpec(
            num_scalar_prefetch=0,
            grid=(grid_b, grid_c, grid_s),
            in_specs=[
                pl.BlockSpec(memory_space=pltpu.MemorySpace.SMEM),          # GeM p
                pl.BlockSpec((tB, tC, tS), lambda b, c, s: (b, c, s)),      # features
                pl.BlockSpec((tC, KH), lambda b, c, s: (c, 0)),             # stacked W
            ],
            out_specs=pl.BlockSpec((1, tB, 1, KH), lambda b, c, s: (c, b, 0, 0)),
            scratch_shapes=[pltpu.VMEM(acc_shape, jnp.float32)],
        ),
        compiler_params=pltpu.CompilerParams(
            dimension_semantics=("parallel", "parallel", "arbitrary"),
            vmem_limit_bytes=vmem_limit),
        cost_estimate=cost,
    )(p_arr, feat, w_cat)

    # Sum the tiny per-C-block partials (trivial) and add the stacked biases.
    logits_cat = jnp.sum(partials[:, :, 0, :], axis=0) + b_cat          # (B, 5K)
    logits = logits_cat.reshape(B, NUM_HEADS, K)
    logit_sum = jnp.sum(logits, axis=1)             # 'logit' = sum of 5 head logits
    return {"logit": logit_sum,
            "list_logits": [logits[:, h, :] for h in range(NUM_HEADS)]}


def _reference(feat_nchw, head_w, head_b, p):
    """Pure-JAX reference of the same math (for correctness checks)."""
    x = jnp.maximum(feat_nchw.astype(jnp.float32), EPS) ** p
    pooled = jnp.mean(x, axis=(2, 3)) ** (1.0 / p)                      # (B, C)
    logits = (jnp.einsum("bc,hck->hbk", pooled, head_w.astype(jnp.float32))
              + head_b.astype(jnp.float32)[:, None, :])
    return logits, jnp.sum(logits, axis=0)


def _check(feat, head_w, head_b, gem_p, rtol, atol, **kw):
    out = timm_classifier_v2_head(feat, head_w, head_b, gem_p, **kw)
    jax.block_until_ready(out["logit"])
    ref_logits, ref_sum = _reference(feat, head_w, head_b, float(gem_p[0]))
    assert jnp.allclose(out["logit"], ref_sum, rtol=rtol, atol=atol), "logit mismatch"
    for i in range(NUM_HEADS):
        assert jnp.allclose(out["list_logits"][i], ref_logits[i],
                            rtol=rtol, atol=atol), f"head {i} mismatch"


if __name__ == "__main__":
    key = jax.random.PRNGKey(0)
    k1, k2, k3, k4 = jax.random.split(key, 4)

    B, C, K = 2, 256, 2                    # small stand-in for encoder feat + classes=2
    bound = 1.0 / float(C) ** 0.5          # nn.Linear init range
    head_w = jax.random.uniform(k2, (NUM_HEADS, C, K), jnp.float32, -bound, bound)
    head_b = jax.random.uniform(k3, (NUM_HEADS, K), jnp.float32, -bound, bound)
    gem_p3 = jnp.array([3.0], dtype=jnp.float32)   # GeM(p=3) -> integer fast path

    # (1) f32, S = 16*16 = 256: single S tile, tB = B, integer-p path.
    feat1 = jax.random.normal(k1, (B, C, 16, 16), dtype=jnp.float32)
    _check(feat1, head_w, head_b, gem_p3, 1e-4, 1e-4)

    # (2) f32, S = 24*24 = 576 with a forced 256-lane tile: multi-tile path,
    #     lane-wide accumulator, masked ragged last tile (64 valid lanes).
    feat2 = jax.random.normal(k4, (B, C, 24, 24), dtype=jnp.float32)
    _check(feat2, head_w, head_b, gem_p3, 1e-4, 1e-4, max_tile_s=256)

    # (3) bf16 features (halves the dominant HBM stream; kernel upcasts in VMEM).
    _check(feat1.astype(jnp.bfloat16), head_w, head_b, gem_p3, 1e-3, 1e-3)

    # (4) B == 1: C is split into two 'parallel' blocks (both v7x TensorCores).
    _check(feat1[:1], head_w, head_b, gem_p3, 1e-4, 1e-4)

    # (5) non-integer p: generic exp/log (EUP) path reading p from SMEM.
    _check(feat1, head_w, head_b, jnp.array([3.2], dtype=jnp.float32), 1e-4, 1e-4)

    print("KERNEL_OK")
</pallas_src>

<mosaic_0001>
module attributes {stable_mosaic.version = 11 : i64} {
  func.func @kernel(%arg0: i32, %arg1: i32, %arg2: i32, %arg3: memref<1xf32, #tpu.memory_space<smem>>, %arg4: memref<2x256x256xf32, #tpu.memory_space<vmem>>, %arg5: memref<256x10xf32, #tpu.memory_space<vmem>>, %arg6: memref<1x2x1x10xf32, #tpu.memory_space<vmem>>, %arg7: memref<2x256xf32, #tpu.memory_space<vmem>>) attributes {dimension_semantics = [#tpu.dimension_semantics<parallel>, #tpu.dimension_semantics<parallel>, #tpu.dimension_semantics<arbitrary>], iteration_bounds = array<i64: 1, 1, 1>, scalar_prefetch = 0 : i64, scratch_operands = 1 : i64, tpu.core_type = #tpu.core_type<tc>, window_params = [{transform_indices = @transform_0, window_bounds = array<i64: 1>}, {transform_indices = @transform_1, window_bounds = array<i64: 2, 256, 256>}, {transform_indices = @transform_2, window_bounds = array<i64: 256, 10>}, {transform_indices = @transform_3, window_bounds = array<i64: 1, 2, 1, 10>}]} {
    %c0_i32 = arith.constant 0 : i32
    %0 = arith.cmpi eq, %arg2, %c0_i32 : i32
    %1 = arith.extui %0 : i1 to i32
    %c0_i32_0 = arith.constant 0 : i32
    %2 = arith.cmpi ne, %1, %c0_i32_0 : i32
    scf.if %2 {
      %cst_10 = arith.constant 0.000000e+00 : f32
      %15 = vector.broadcast %cst_10 : f32 to vector<2x256xf32>
      %c0_11 = arith.constant 0 : index
      %c0_12 = arith.constant 0 : index
      %16 = vector.load %arg7[%c0_11, %c0_12] : memref<2x256xf32, #tpu.memory_space<vmem>>, vector<2x256xf32>
      tpu.vector_store %arg7[%c0_11, %c0_12], %15 {strides = array<i32>} : memref<2x256xf32, #tpu.memory_space<vmem>>, vector<2x256xf32>,
    } else {
    }
    %c0 = arith.constant 0 : index
    %c0_1 = arith.constant 0 : index
    %c0_2 = arith.constant 0 : index
    %3 = vector.load %arg4[%c0, %c0_1, %c0_2] : memref<2x256x256xf32, #tpu.memory_space<vmem>>, vector<2x256x256xf32>
    %cst = arith.constant 9.99999997E-7 : f32
    %4 = vector.broadcast %cst : f32 to vector<2x256x256xf32>
    %5 = arith.maximumf %3, %4 : vector<2x256x256xf32>
    %6 = arith.mulf %5, %5 : vector<2x256x256xf32>
    %7 = arith.mulf %6, %5 : vector<2x256x256xf32>
    %c0_3 = arith.constant 0 : index
    %c0_4 = arith.constant 0 : index
    %8 = vector.load %arg7[%c0_3, %c0_4] : memref<2x256xf32, #tpu.memory_space<vmem>>, vector<2x256xf32>
    %cst_5 = arith.constant dense<0.000000e+00> : vector<2x256xf32>
    %9 = vector.multi_reduction <add>, %7, %cst_5 [2] : vector<2x256x256xf32> to vector<2x256xf32>
    %10 = arith.addf %8, %9 : vector<2x256xf32>
    %c0_6 = arith.constant 0 : index
    %c0_7 = arith.constant 0 : index
    %11 = vector.load %arg7[%c0_6, %c0_7] : memref<2x256xf32, #tpu.memory_space<vmem>>, vector<2x256xf32>
    tpu.vector_store %arg7[%c0_6, %c0_7], %10 {strides = array<i32>} : memref<2x256xf32, #tpu.memory_space<vmem>>, vector<2x256xf32>,
    %c0_i32_8 = arith.constant 0 : i32
    %12 = arith.cmpi eq, %arg2, %c0_i32_8 : i32
    %13 = arith.extui %12 : i1 to i32
    %c0_i32_9 = arith.constant 0 : i32
    %14 = arith.cmpi ne, %13, %c0_i32_9 : i32
    scf.if %14 {
      %c0_10 = arith.constant 0 : index
      %c0_11 = arith.constant 0 : index
      %15 = vector.load %arg7[%c0_10, %c0_11] : memref<2x256xf32, #tpu.memory_space<vmem>>, vector<2x256xf32>
      %cst_12 = arith.constant 3.906250e-03 : f32
      %16 = vector.broadcast %cst_12 : f32 to vector<2x256xf32>
      %17 = arith.mulf %15, %16 : vector<2x256xf32>
      %18 = math.log %17 : vector<2x256xf32>
      %cst_13 = arith.constant 0.333333343 : f32
      %19 = vector.broadcast %cst_13 : f32 to vector<2x256xf32>
      %20 = arith.mulf %18, %19 : vector<2x256xf32>
      %21 = math.exp %20 : vector<2x256xf32>
      %c0_14 = arith.constant 0 : index
      %c0_15 = arith.constant 0 : index
      %22 = vector.load %arg5[%c0_14, %c0_15] : memref<256x10xf32, #tpu.memory_space<vmem>>, vector<256x10xf32>
      %cst_16 = arith.constant dense<0.000000e+00> : vector<2x10xf32>
      %23 = tpu.matmul %21, %22, %cst_16 {dimension_numbers = #tpu.dot_dimension_numbers<[1], [0], [0], [1], [0, 0, 1, 1], [], []>} : vector<2x256xf32>, vector<256x10xf32>, vector<2x10xf32> -> vector<2x10xf32>
      %24 = vector.shape_cast %23 : vector<2x10xf32> to vector<1x2x1x10xf32>
      %c0_17 = arith.constant 0 : index
      %c0_18 = arith.constant 0 : index
      %c0_19 = arith.constant 0 : index
      %c0_20 = arith.constant 0 : index
      %25 = vector.load %arg6[%c0_17, %c0_18, %c0_19, %c0_20] : memref<1x2x1x10xf32, #tpu.memory_space<vmem>>, vector<1x2x1x10xf32>
      tpu.vector_store %arg6[%c0_17, %c0_18, %c0_19, %c0_20], %24 {strides = array<i32>} : memref<1x2x1x10xf32, #tpu.memory_space<vmem>>, vector<1x2x1x10xf32>,
    } else {
    }
    return
  }
  func.func @transform_0(%arg0: i32, %arg1: i32, %arg2: i32) -> i32 {
    %c0_i32 = arith.constant 0 : i32
    %c0_i32_0 = arith.constant 0 : i32
    return %c0_i32 : i32
  }
  func.func @transform_1(%arg0: i32, %arg1: i32, %arg2: i32) -> (i32, i32, i32) {
    %c0_i32 = arith.constant 0 : i32
    return %arg0, %arg1, %arg2 : i32, i32, i32
  }
  func.func @transform_2(%arg0: i32, %arg1: i32, %arg2: i32) -> (i32, i32) {
    %c0_i32 = arith.constant 0 : i32
    %c0_i32_0 = arith.constant 0 : i32
    return %arg1, %c0_i32 : i32, i32
  }
  func.func @transform_3(%arg0: i32, %arg1: i32, %arg2: i32) -> (i32, i32, i32, i32) {
    %c0_i32 = arith.constant 0 : i32
    %c0_i32_0 = arith.constant 0 : i32
    %c0_i32_1 = arith.constant 0 : i32
    return %arg1, %arg0, %c0_i32, %c0_i32_0 : i32, i32, i32, i32
  }
}

</mosaic_0001>

<bundles_post_ra>
// kernel: tpu_custom_call.1
= control target key start
LH: loop header
LB: loop body
LE: loop exit
PB: predicated region body
PF: predicated region fallthrough
CT: control target
= control target key end

     0   :  { %9 = vsyncpa [#allocation5], 0  ;;  %s5576_s0 = inlined_call_operand.<no memory space> [shape: f32[1], index: 0, kind: input, shape index: {}]   ;;  %s5577_s1 = inlined_call_operand.hbm [shape: f32[2,256,256], index: 1, kind: input, shape index: {}]   ;;  %s5578_s2 = inlined_call_operand.vmem [shape: f32[256,10], index: 2, kind: input, shape index: {}]   ;;  %s5579_s3 = inlined_call_operand.hbm [shape: f32[1,2,1,10], index: 3, kind: output, shape index: {}]  }
   0x1   :  { %10 = vsyncpa [#allocation6], 0  ;;  %s4540_s12 = smov [#allocation4]   ;;  %s4492_s16 = scalar_lea.hbm %s5577_s1, 16384 }
   0x2   :  { %s18_s13 = sshll.u32 %s4540_s12, 4  ;;  %p4493_p0 = scmp.ne.s32.totalorder %s5577_s1, %s4492_s16  ;;  %s19_s13 = int_to_ptr.vmem [resolvable:$true] %s18_s13 }
   0x3   :  { %p4496_p1 = scmp.lt.u32.totalorder %s4492_s16, %s5577_s1 }
   0x5   :  { %p4498_p2 = pnand %p4496_p1, %p4493_p0 }
   0x7   :  { %4501 = shalt.err (!%p4498_p2)
}
   0x8   :  { %s4502_s20 = scalar_lea.vmem %s19_s13, 16384  ;;  %p4507_p4 = scmp.lt.s32.totalorder %s19_s13, %s19_s13 }
   0x9   :  { %p4503_p3 = scmp.ne.s32.totalorder %s19_s13, %s4502_s20  ;;  %p4508_p5 = scmp.lt.s32.totalorder %s4502_s20, %s4502_s20 }
   0xb   :  { %p4509_p6 = por %p4508_p5, %p4507_p4 }
   0xd   :  { %p4510_p7 = pnand %p4509_p6, %p4503_p3 }
   0xf   :  { %4513 = shalt.err (!%p4510_p7)
}
  0x10   :  { %s4541_s21 = smov 256   ;;  %s4542_s22 = smov 16  }
  0x11   :  { %24 = dma.hbm_to_vmem [thread:$0]  %s5577_s1, 16384, %s19_s13, [#allocation5], %s4541_s21, %s4541_s21, %s4542_s22  }
  0x12   :  { %4536 = dma.done.wait [#allocation5], 16384  }
  0x13   :  { %4537 = vsyncadd [#allocation5], 4294950912  ;;  %v67_v0 = vld [vmem:[#allocation4 + $0x100] sm:$0xff]  ;;  %v68_v1 = vld [vmem:[#allocation4 + $0x108] sm:$0xff]  ;;  %vm3887_vm0 = vcmask 130112   ;;  %vm3894_vm1 = vcmask 195712  }
  0x14   :  { %v35_v2 = vld [vmem:[#allocation4] sm:$0xff]  ;;  %v195_v3 = vmax.f32 %v67_v0, 1e-06  ;;  %v196_v4 = vmax.f32 %v68_v1, 1e-06  ;;  %v36_v5 = vld [vmem:[#allocation4 + $0x8] sm:$0xff] }
  0x15   :  { %v69_v6 = vld [vmem:[#allocation4 + $0x110] sm:$0xff]  ;;  %v163_v7 = vmax.f32 %v35_v2, 1e-06  ;;  %v164_v8 = vmax.f32 %v36_v5, 1e-06  ;;  %v70_v9 = vld [vmem:[#allocation4 + $0x118] sm:$0xff] }
  0x16   :  { %v37_v10 = vld [vmem:[#allocation4 + $0x10] sm:$0xff]  ;;  %v323_v11 = vmul.f32 %v195_v3, %v195_v3  ;;  %v324_v12 = vmul.f32 %v196_v4, %v196_v4  ;;  %v197_v13 = vmax.f32 %v69_v6, 1e-06  ;;  %v198_v14 = vmax.f32 %v70_v9, 1e-06  ;;  %v38_v15 = vld [vmem:[#allocation4 + $0x18] sm:$0xff] }
  0x17   :  { %v291_v16 = vmul.f32 %v163_v7, %v163_v7  ;;  %v292_v17 = vmul.f32 %v164_v8, %v164_v8  ;;  %v165_v18 = vmax.f32 %v37_v10, 1e-06  ;;  %v166_v19 = vmax.f32 %v38_v15, 1e-06  ;;  %v101_v20 = vld [vmem:[#allocation4 + $0x210] sm:$0xff]  ;;  %v102_v25 = vld [vmem:[#allocation4 + $0x218] sm:$0xff] }
  0x18   :  { %v451_v21 = vmul.f32 %v323_v11, %v195_v3  ;;  %v452_v22 = vmul.f32 %v324_v12, %v196_v4  ;;  %v325_v23 = vmul.f32 %v197_v13, %v197_v13  ;;  %v326_v24 = vmul.f32 %v198_v14, %v198_v14  ;;  %v133_v30 = vld [vmem:[#allocation4 + $0x310] sm:$0xff]  ;;  %v134_v31 = vld [vmem:[#allocation4 + $0x318] sm:$0xff]  ;;  %v99_v36 = vld [vmem:[#allocation4 + $0x200] sm:$0xff] }
  0x19   :  { %v419_v26 = vmul.f32 %v291_v16, %v163_v7  ;;  %v420_v27 = vmul.f32 %v292_v17, %v164_v8  ;;  %v293_v28 = vmul.f32 %v165_v18, %v165_v18  ;;  %v294_v29 = vmul.f32 %v166_v19, %v166_v19  ;;  %v100_v37 = vld [vmem:[#allocation4 + $0x208] sm:$0xff]  ;;  %v71_v42 = vld [vmem:[#allocation4 + $0x120] sm:$0xff] }
  0x1a   :  { %v596_v32 = vadd.f32 %v452_v22, %v451_v21  ;;  %v453_v33 = vmul.f32 %v325_v23, %v197_v13  ;;  %v454_v34 = vmul.f32 %v326_v24, %v198_v14  ;;  %v229_v35 = vmax.f32 %v101_v20, 1e-06  ;;  %v72_v47 = vld [vmem:[#allocation4 + $0x128] sm:$0xff]  ;;  %v131_v52 = vld [vmem:[#allocation4 + $0x300] sm:$0xff]  ;;  %v73_v14 = vld [vmem:[#allocation4 + $0x130] sm:$0xff] }
  0x1b   :  { %v548_v38 = vadd.f32 %v420_v27, %v419_v26  ;;  %v421_v39 = vmul.f32 %v293_v28, %v165_v18  ;;  %v422_v40 = vmul.f32 %v294_v29, %v166_v19  ;;  %v230_v41 = vmax.f32 %v102_v25, 1e-06  ;;  %v132_v61 = vld [vmem:[#allocation4 + $0x308] sm:$0xff]  ;;  %v135_v2 = vld [vmem:[#allocation4 + $0x320] sm:$0xff]  ;;  %v74_v19 = vld [vmem:[#allocation4 + $0x138] sm:$0xff] }
  0x1c   :  { %597 = vadd.xlane.f32.xlu1 %v596_v32  ;;  %v599_v43 = vadd.f32 %v454_v34, %v453_v33  ;;  %v357_v44 = vmul.f32 %v229_v35, %v229_v35  ;;  %v261_v45 = vmax.f32 %v133_v30, 1e-06  ;;  %v262_v46 = vmax.f32 %v134_v31, 1e-06  ;;  %v136_v3 = vld [vmem:[#allocation4 + $0x328] sm:$0xff]  ;;  %v39_v8 = vld [vmem:[#allocation4 + $0x20] sm:$0xff] }
  0x1d   :  { %549 = vadd.xlane.f32.xlu0 %v548_v38  ;;  %v551_v48 = vadd.f32 %v422_v40, %v421_v39  ;;  %v358_v49 = vmul.f32 %v230_v41, %v230_v41  ;;  %v227_v50 = vmax.f32 %v99_v36, 1e-06  ;;  %v228_v51 = vmax.f32 %v100_v37, 1e-06  ;;  %v40_v9 = vld [vmem:[#allocation4 + $0x28] sm:$0xff]  ;;  %v103_v24 = vld [vmem:[#allocation4 + $0x220] sm:$0xff] }
  0x1e   :  { %v485_v53 = vmul.f32 %v357_v44, %v229_v35  ;;  %v389_v54 = vmul.f32 %v261_v45, %v261_v45  ;;  %v390_v55 = vmul.f32 %v262_v46, %v262_v46  ;;  %v199_v56 = vmax.f32 %v71_v42, 1e-06  ;;  %v104_v33 = vld [vmem:[#allocation4 + $0x228] sm:$0xff]  ;;  %v137_v38 = vld [vmem:[#allocation4 + $0x330] sm:$0xff]  ;;  %v138_v39 = vld [vmem:[#allocation4 + $0x338] sm:$0xff] }
  0x1f   :  { %v486_v57 = vmul.f32 %v358_v49, %v230_v41  ;;  %v355_v58 = vmul.f32 %v227_v50, %v227_v50  ;;  %v356_v59 = vmul.f32 %v228_v51, %v228_v51  ;;  %v200_v60 = vmax.f32 %v72_v47, 1e-06  ;;  %v41_v44 = vld [vmem:[#allocation4 + $0x30] sm:$0xff]  ;;  %v75_v49 = vld [vmem:[#allocation4 + $0x140] sm:$0xff] }
  0x20   :  { %600 = vadd.xlane.f32.xlu1 %v599_v43  ;;  %v517_v62 = vmul.f32 %v389_v54, %v261_v45  ;;  %v518_v63 = vmul.f32 %v390_v55, %v262_v46  ;;  %v327_v0 = vmul.f32 %v199_v56, %v199_v56  ;;  %v259_v1 = vmax.f32 %v131_v52, 1e-06  ;;  %v42_v45 = vld [vmem:[#allocation4 + $0x38] sm:$0xff]  ;;  %v76_v54 = vld [vmem:[#allocation4 + $0x148] sm:$0xff] }
  0x21   :  { %552 = vadd.xlane.f32.xlu0 %v551_v48  ;;  %v647_v4 = vadd.f32 %v486_v57, %v485_v53  ;;  %v483_v5 = vmul.f32 %v355_v58, %v227_v50  ;;  %v484_v6 = vmul.f32 %v356_v59, %v228_v51  ;;  %v328_v7 = vmul.f32 %v200_v60, %v200_v60  ;;  %v105_v59 = vld [vmem:[#allocation4 + $0x230] sm:$0xff] }
  0x22   :  { %v695_v10 = vadd.f32 %v518_v63, %v517_v62  ;;  %v455_v11 = vmul.f32 %v327_v0, %v199_v56  ;;  %v260_v12 = vmax.f32 %v132_v61, 1e-06  ;;  %v387_v13 = vmul.f32 %v259_v1, %v259_v1 }
  0x23   :  { %v644_v15 = vadd.f32 %v484_v6, %v483_v5  ;;  %v456_v16 = vmul.f32 %v328_v7, %v200_v60  ;;  %v263_v17 = vmax.f32 %v135_v2, 1e-06  ;;  %v264_v18 = vmax.f32 %v136_v3, 1e-06 }
  0x24   :  { %648 = vadd.xlane.f32.xlu1 %v647_v4  ;;  %v388_v20 = vmul.f32 %v260_v12, %v260_v12  ;;  %v515_v21 = vmul.f32 %v387_v13, %v259_v1  ;;  %v167_v22 = vmax.f32 %v39_v8, 1e-06  ;;  %v168_v23 = vmax.f32 %v40_v9, 1e-06  ;;  %v106_v4 = vld [vmem:[#allocation4 + $0x238] sm:$0xff]  ;;  %v139_v9 = vld [vmem:[#allocation4 + $0x340] sm:$0xff] }
  0x25   :  { %645 = vadd.xlane.f32.xlu0 %v644_v15  ;;  %v602_v25 = vadd.f32 %v456_v16, %v455_v11  ;;  %v391_v26 = vmul.f32 %v263_v17, %v263_v17  ;;  %v392_v27 = vmul.f32 %v264_v18, %v264_v18  ;;  %v201_v28 = vmax.f32 %v73_v14, 1e-06  ;;  %v43_v15 = vld [vmem:[#allocation4 + $0x40] sm:$0xff]  ;;  %v44_v16 = vld [vmem:[#allocation4 + $0x48] sm:$0xff] }
  0x26   :  { %v516_v29 = vmul.f32 %v388_v20, %v260_v12  ;;  %v295_v30 = vmul.f32 %v167_v22, %v167_v22  ;;  %v296_v31 = vmul.f32 %v168_v23, %v168_v23  ;;  %v202_v32 = vmax.f32 %v74_v19, 1e-06 }
  0x27   :  { %v519_v34 = vmul.f32 %v391_v26, %v263_v17  ;;  %v520_v35 = vmul.f32 %v392_v27, %v264_v18  ;;  %v329_v36 = vmul.f32 %v201_v28, %v201_v28  ;;  %v231_v37 = vmax.f32 %v103_v24, 1e-06  ;;  %v78_v26 = vld [vmem:[#allocation4 + $0x158] sm:$0xff] }
  0x28   :  { %696 = vadd.xlane.f32.xlu1 %v695_v10  ;;  %v692_v40 = vadd.f32 %v516_v29, %v515_v21  ;;  %v423_v41 = vmul.f32 %v295_v30, %v167_v22  ;;  %v424_v42 = vmul.f32 %v296_v31, %v168_v23  ;;  %v330_v43 = vmul.f32 %v202_v32, %v202_v32  ;;  %v140_v10 = vld [vmem:[#allocation4 + $0x348] sm:$0xff]  ;;  %v77_v21 = vld [vmem:[#allocation4 + $0x150] sm:$0xff]  ;;  %v107_v31 = vld [vmem:[#allocation4 + $0x240] sm:$0xff] }
  0x29   :  { %v698_v46 = vadd.f32 %v520_v35, %v519_v34  ;;  %v232_v47 = vmax.f32 %v104_v33, 1e-06  ;;  %v359_v48 = vmul.f32 %v231_v37, %v231_v37  ;;  %v457_v51 = vmul.f32 %v329_v36, %v201_v28 }
  0x2a   :  { %693 = vadd.xlane.f32.xlu0 %v692_v40  ;;  %v554_v50 = vadd.f32 %v424_v42, %v423_v41  ;;  %v265_v52 = vmax.f32 %v137_v38, 1e-06  ;;  %v266_v53 = vmax.f32 %v138_v39, 1e-06  ;;  %v169_v57 = vmax.f32 %v41_v44, 1e-06 }
  0x2b   :  { %v360_v55 = vmul.f32 %v232_v47, %v232_v47  ;;  %v487_v56 = vmul.f32 %v359_v48, %v231_v37  ;;  %v170_v58 = vmax.f32 %v42_v45, 1e-06  ;;  %v458_v60 = vmul.f32 %v330_v43, %v202_v32  ;;  %v108_v40 = vld [vmem:[#allocation4 + $0x248] sm:$0xff]  ;;  %v141_v44 = vld [vmem:[#allocation4 + $0x350] sm:$0xff]  ;;  %v142_v45 = vld [vmem:[#allocation4 + $0x358] sm:$0xff] }
  0x2c   :  { %603 = vadd.xlane.f32.xlu1 %v602_v25  ;;  %v393_v61 = vmul.f32 %v265_v52, %v265_v52  ;;  %v394_v62 = vmul.f32 %v266_v53, %v266_v53  ;;  %v203_v63 = vmax.f32 %v75_v49, 1e-06  ;;  %v297_v1 = vmul.f32 %v169_v57, %v169_v57 }
  0x2d   :  { %v488_v0 = vmul.f32 %v360_v55, %v232_v47  ;;  %v298_v2 = vmul.f32 %v170_v58, %v170_v58  ;;  %v204_v3 = vmax.f32 %v76_v54, 1e-06  ;;  %v233_v8 = vmax.f32 %v105_v59, 1e-06 }
  0x2e   :  { %555 = vadd.xlane.f32.xlu0 %v554_v50  ;;  %v521_v5 = vmul.f32 %v393_v61, %v265_v52  ;;  %v522_v6 = vmul.f32 %v394_v62, %v266_v53  ;;  %v331_v7 = vmul.f32 %v203_v63, %v203_v63  ;;  %v425_v12 = vmul.f32 %v297_v1, %v169_v57  ;;  %v45_v50 = vld [vmem:[#allocation4 + $0x50] sm:$0xff]  ;;  %v80_v61 = vld [vmem:[#allocation4 + $0x168] sm:$0xff] }
  0x2f   :  { %v650_v11 = vadd.f32 %v488_v0, %v487_v56  ;;  %v426_v13 = vmul.f32 %v298_v2, %v170_v58  ;;  %v332_v14 = vmul.f32 %v204_v3, %v204_v3  ;;  %v605_v17 = vadd.f32 %v458_v60, %v457_v51  ;;  %v46_v51 = vld [vmem:[#allocation4 + $0x58] sm:$0xff]  ;;  %v79_v56 = vld [vmem:[#allocation4 + $0x160] sm:$0xff]  ;;  %v109_v2 = vld [vmem:[#allocation4 + $0x250] sm:$0xff] }
  0x30   :  { %699 = vadd.xlane.f32.xlu1 %v698_v46  ;;  %v459_v18 = vmul.f32 %v331_v7, %v203_v63  ;;  %v234_v19 = vmax.f32 %v106_v4, 1e-06  ;;  %v361_v20 = vmul.f32 %v233_v8, %v233_v8  ;;  %v267_v24 = vmax.f32 %v139_v9, 1e-06 }
  0x31   :  { %v557_v22 = vadd.f32 %v426_v13, %v425_v12  ;;  %v460_v23 = vmul.f32 %v332_v14, %v204_v3  ;;  %v268_v25 = vmax.f32 %v140_v10, 1e-06  ;;  %v171_v29 = vmax.f32 %v43_v15, 1e-06  ;;  %v143_v15 = vld [vmem:[#allocation4 + $0x360] sm:$0xff] }
  0x32   :  { %651 = vadd.xlane.f32.xlu0 %v650_v11  ;;  %v362_v27 = vmul.f32 %v234_v19, %v234_v19  ;;  %v489_v28 = vmul.f32 %v361_v20, %v233_v8  ;;  %v172_v30 = vmax.f32 %v44_v16, 1e-06  ;;  %v701_v32 = vadd.f32 %v522_v6, %v521_v5  ;;  %v110_v11 = vld [vmem:[#allocation4 + $0x258] sm:$0xff]  ;;  %v144_v16 = vld [vmem:[#allocation4 + $0x368] sm:$0xff]  ;;  %v47_v20 = vld [vmem:[#allocation4 + $0x60] sm:$0xff] }
  0x33   :  { %v395_v33 = vmul.f32 %v267_v24, %v267_v24  ;;  %v396_v34 = vmul.f32 %v268_v25, %v268_v25  ;;  %v205_v35 = vmax.f32 %v77_v21, 1e-06  ;;  %v299_v37 = vmul.f32 %v171_v29, %v171_v29  ;;  %v48_v21 = vld [vmem:[#allocation4 + $0x68] sm:$0xff] }
  0x34   :  { %606 = vadd.xlane.f32.xlu1 %v605_v17  ;;  %v490_v36 = vmul.f32 %v362_v27, %v234_v19  ;;  %v300_v38 = vmul.f32 %v172_v30, %v172_v30  ;;  %v206_v39 = vmax.f32 %v78_v26, 1e-06  ;;  %v608_v41 = vadd.f32 %v460_v23, %v459_v18 }
  0x35   :  { %v333_v42 = vmul.f32 %v205_v35, %v205_v35  ;;  %v235_v43 = vmax.f32 %v107_v31, 1e-06  ;;  %v427_v47 = vmul.f32 %v299_v37, %v171_v29  ;;  %v523_v52 = vmul.f32 %v395_v33, %v267_v24 }
  0x36   :  { %558 = vadd.xlane.f32.xlu0 %v557_v22  ;;  %v653_v46 = vadd.f32 %v490_v36, %v489_v28  ;;  %v428_v48 = vmul.f32 %v300_v38, %v172_v30  ;;  %v334_v49 = vmul.f32 %v206_v39, %v206_v39  ;;  %v524_v53 = vmul.f32 %v396_v34, %v268_v25  ;;  %v81_v34 = vld [vmem:[#allocation4 + $0x170] sm:$0xff] }
  0x37   :  { %v236_v54 = vmax.f32 %v108_v40, 1e-06  ;;  %v363_v55 = vmul.f32 %v235_v43, %v235_v43  ;;  %v461_v58 = vmul.f32 %v333_v42, %v205_v35  ;;  %v269_v59 = vmax.f32 %v141_v44, 1e-06  ;;  %v111_v35 = vld [vmem:[#allocation4 + $0x260] sm:$0xff]  ;;  %v82_v40 = vld [vmem:[#allocation4 + $0x178] sm:$0xff] }
  0x38   :  { %702 = vadd.xlane.f32.xlu1 %v701_v32  ;;  %v560_v57 = vadd.f32 %v428_v48, %v427_v47  ;;  %v270_v60 = vmax.f32 %v142_v45, 1e-06  ;;  %v462_v62 = vmul.f32 %v334_v49, %v206_v39  ;;  %v173_v0 = vmax.f32 %v45_v50, 1e-06  ;;  %v112_v45 = vld [vmem:[#allocation4 + $0x268] sm:$0xff]  ;;  %v49_v50 = vld [vmem:[#allocation4 + $0x70] sm:$0xff] }
  0x39   :  { %v364_v63 = vmul.f32 %v236_v54, %v236_v54  ;;  %v174_v1 = vmax.f32 %v46_v51, 1e-06  ;;  %v491_v3 = vmul.f32 %v363_v55, %v235_v43  ;;  %v397_v4 = vmul.f32 %v269_v59, %v269_v59  ;;  %v50_v51 = vld [vmem:[#allocation4 + $0x78] sm:$0xff] }
  0x3a   :  { %654 = vadd.xlane.f32.xlu0 %v653_v46  ;;  %v398_v5 = vmul.f32 %v270_v60, %v270_v60  ;;  %v207_v6 = vmax.f32 %v79_v56, 1e-06  ;;  %v301_v8 = vmul.f32 %v173_v0, %v173_v0  ;;  %v208_v10 = vmax.f32 %v80_v61, 1e-06  ;;  %v145_v56 = vld [vmem:[#allocation4 + $0x370] sm:$0xff] }
  0x3b   :  { %v492_v7 = vmul.f32 %v364_v63, %v236_v54  ;;  %v302_v9 = vmul.f32 %v174_v1, %v174_v1  ;;  %v704_v12 = vadd.f32 %v524_v53, %v523_v52  ;;  %v237_v14 = vmax.f32 %v109_v2, 1e-06 }
  0x3c   :  { %609 = vadd.xlane.f32.xlu1 %v608_v41  ;;  %v335_v13 = vmul.f32 %v207_v6, %v207_v6  ;;  %v429_v17 = vmul.f32 %v301_v8, %v173_v0  ;;  %v336_v19 = vmul.f32 %v208_v10, %v208_v10  ;;  %v611_v22 = vadd.f32 %v462_v62, %v461_v58  ;;  %v83_v62 = vld [vmem:[#allocation4 + $0x180] sm:$0xff]  ;;  %v84_v8 = vld [vmem:[#allocation4 + $0x188] sm:$0xff] }
  0x3d   :  { %v430_v18 = vmul.f32 %v302_v9, %v174_v1  ;;  %v656_v23 = vadd.f32 %v492_v7, %v491_v3  ;;  %v238_v24 = vmax.f32 %v110_v11, 1e-06  ;;  %v365_v25 = vmul.f32 %v237_v14, %v237_v14  ;;  %v113_v3 = vld [vmem:[#allocation4 + $0x270] sm:$0xff] }
  0x3e   :  { %561 = vadd.xlane.f32.xlu0 %v560_v57  ;;  %v525_v26 = vmul.f32 %v397_v4, %v269_v59  ;;  %v526_v27 = vmul.f32 %v398_v5, %v270_v60  ;;  %v271_v28 = vmax.f32 %v143_v15, 1e-06  ;;  %v272_v29 = vmax.f32 %v144_v16, 1e-06  ;;  %v146_v57 = vld [vmem:[#allocation4 + $0x378] sm:$0xff] }
  0x3f   :  { %v463_v30 = vmul.f32 %v335_v13, %v207_v6  ;;  %v366_v31 = vmul.f32 %v238_v24, %v238_v24  ;;  %v175_v32 = vmax.f32 %v47_v20, 1e-06  ;;  %v176_v33 = vmax.f32 %v48_v21, 1e-06  ;;  %v114_v13 = vld [vmem:[#allocation4 + $0x278] sm:$0xff]  ;;  %v52_v20 = vld [vmem:[#allocation4 + $0x88] sm:$0xff] }
  0x40   :  { %705 = vadd.xlane.f32.xlu1 %v704_v12  ;;  %v563_v36 = vadd.f32 %v430_v18, %v429_v17  ;;  %v464_v37 = vmul.f32 %v336_v19, %v208_v10  ;;  %v493_v38 = vmul.f32 %v365_v25, %v237_v14  ;;  %v399_v39 = vmul.f32 %v271_v28, %v271_v28  ;;  %v51_v19 = vld [vmem:[#allocation4 + $0x80] sm:$0xff] }
  0x41   :  { %v494_v41 = vmul.f32 %v366_v31, %v238_v24  ;;  %v400_v42 = vmul.f32 %v272_v29, %v272_v29  ;;  %v303_v43 = vmul.f32 %v175_v32, %v175_v32  ;;  %v304_v44 = vmul.f32 %v176_v33, %v176_v33  ;;  %v147_v25 = vld [vmem:[#allocation4 + $0x380] sm:$0xff] }
  0x42   :  { %657 = vadd.xlane.f32.xlu0 %v656_v23  ;;  %v209_v46 = vmax.f32 %v81_v34, 1e-06  ;;  %v239_v47 = vmax.f32 %v111_v35, 1e-06  ;;  %v707_v48 = vadd.f32 %v526_v27, %v525_v26  ;;  %v210_v49 = vmax.f32 %v82_v40, 1e-06 }
  0x43   :  { %v614_v52 = vadd.f32 %v464_v37, %v463_v30  ;;  %v527_v53 = vmul.f32 %v399_v39, %v271_v28  ;;  %v240_v54 = vmax.f32 %v112_v45, 1e-06  ;;  %v659_v58 = vadd.f32 %v494_v41, %v493_v38  ;;  %v148_v26 = vld [vmem:[#allocation4 + $0x388] sm:$0xff]  ;;  %v115_v35 = vld [vmem:[#allocation4 + $0x280] sm:$0xff]  ;;  %v85_v45 = vld [vmem:[#allocation4 + $0x190] sm:$0xff] }
  0x44   :  { %612 = vadd.xlane.f32.xlu1 %v611_v22  ;;  %v367_v55 = vmul.f32 %v239_v47, %v239_v47  ;;  %v528_v59 = vmul.f32 %v400_v42, %v272_v29  ;;  %v431_v60 = vmul.f32 %v303_v43, %v175_v32  ;;  %v432_v61 = vmul.f32 %v304_v44, %v176_v33  ;;  %v116_v42 = vld [vmem:[#allocation4 + $0x288] sm:$0xff] }
  0x45   :  { %v337_v63 = vmul.f32 %v209_v46, %v209_v46  ;;  %v368_v0 = vmul.f32 %v240_v54, %v240_v54  ;;  %v177_v1 = vmax.f32 %v49_v50, 1e-06  ;;  %v178_v2 = vmax.f32 %v50_v51, 1e-06 }
  0x46   :  { %564 = vadd.xlane.f32.xlu0 %v563_v36  ;;  %v338_v4 = vmul.f32 %v210_v49, %v210_v49  ;;  %v495_v5 = vmul.f32 %v367_v55, %v239_v47  ;;  %v273_v6 = vmax.f32 %v145_v56, 1e-06  ;;  %v274_v7 = vmax.f32 %v146_v57, 1e-06  ;;  %v53_v56 = vld [vmem:[#allocation4 + $0x90] sm:$0xff]  ;;  %v54_v57 = vld [vmem:[#allocation4 + $0x98] sm:$0xff] }
  0x47   :  { %v496_v9 = vmul.f32 %v368_v0, %v240_v54  ;;  %v305_v10 = vmul.f32 %v177_v1, %v177_v1  ;;  %v306_v11 = vmul.f32 %v178_v2, %v178_v2  ;;  %v211_v12 = vmax.f32 %v83_v62, 1e-06 }
  0x48   :  { %708 = vadd.xlane.f32.xlu1 %v707_v48  ;;  %v566_v14 = vadd.f32 %v432_v61, %v431_v60  ;;  %v241_v15 = vmax.f32 %v113_v3, 1e-06  ;;  %v710_v16 = vadd.f32 %v528_v59, %v527_v53  ;;  %v465_v17 = vmul.f32 %v337_v63, %v209_v46  ;;  %v86_v46 = vld [vmem:[#allocation4 + $0x198] sm:$0xff] }
  0x49   :  { %v212_v18 = vmax.f32 %v84_v8, 1e-06  ;;  %v466_v21 = vmul.f32 %v338_v4, %v210_v49  ;;  %v401_v22 = vmul.f32 %v273_v6, %v273_v6  ;;  %v402_v23 = vmul.f32 %v274_v7, %v274_v7 }
  0x4a   :  { %660 = vadd.xlane.f32.xlu0 %v659_v58  ;;  %v242_v24 = vmax.f32 %v114_v13, 1e-06  ;;  %v662_v27 = vadd.f32 %v496_v9, %v495_v5  ;;  %v433_v28 = vmul.f32 %v305_v10, %v177_v1  ;;  %v434_v29 = vmul.f32 %v306_v11, %v178_v2  ;;  %v149_v1 = vld [vmem:[#allocation4 + $0x390] sm:$0xff]  ;;  %v150_v2 = vld [vmem:[#allocation4 + $0x398] sm:$0xff] }
  0x4b   :  { %v339_v30 = vmul.f32 %v211_v12, %v211_v12  ;;  %v369_v31 = vmul.f32 %v241_v15, %v241_v15  ;;  %v179_v33 = vmax.f32 %v51_v19, 1e-06  ;;  %v180_v34 = vmax.f32 %v52_v20, 1e-06  ;;  %v117_v9 = vld [vmem:[#allocation4 + $0x290] sm:$0xff]  ;;  %v118_v10 = vld [vmem:[#allocation4 + $0x298] sm:$0xff] }
  0x4c   :  { %615 = vadd.xlane.f32.xlu1 %v614_v52  ;;  %v370_v32 = vmul.f32 %v242_v24, %v242_v24  ;;  %v340_v36 = vmul.f32 %v212_v18, %v212_v18  ;;  %v275_v37 = vmax.f32 %v147_v25, 1e-06  ;;  %v276_v38 = vmax.f32 %v148_v26, 1e-06  ;;  %v56_v25 = vld [vmem:[#allocation4 + $0xa8] sm:$0xff] }
  0x4d   :  { %v617_v39 = vadd.f32 %v466_v21, %v465_v17  ;;  %v529_v40 = vmul.f32 %v401_v22, %v273_v6  ;;  %v530_v41 = vmul.f32 %v402_v23, %v274_v7  ;;  %v307_v43 = vmul.f32 %v179_v33, %v179_v33 }
  0x4e   :  { %567 = vadd.xlane.f32.xlu0 %v566_v14  ;;  %v308_v44 = vmul.f32 %v180_v34, %v180_v34  ;;  %v243_v47 = vmax.f32 %v115_v35, 1e-06  ;;  %v569_v48 = vadd.f32 %v434_v29, %v433_v28  ;;  %v467_v49 = vmul.f32 %v339_v30, %v211_v12 }
  0x4f   :  { %v497_v50 = vmul.f32 %v369_v31, %v241_v15  ;;  %v498_v51 = vmul.f32 %v370_v32, %v242_v24  ;;  %v468_v52 = vmul.f32 %v340_v36, %v212_v18  ;;  %v403_v53 = vmul.f32 %v275_v37, %v275_v37  ;;  %v87_v15 = vld [vmem:[#allocation4 + $0x1a0] sm:$0xff] }
  0x50   :  { %711 = vadd.xlane.f32.xlu1 %v710_v16  ;;  %v404_v54 = vmul.f32 %v276_v38, %v276_v38  ;;  %v244_v55 = vmax.f32 %v116_v42, 1e-06  ;;  %v713_v58 = vadd.f32 %v530_v41, %v529_v40  ;;  %v213_v59 = vmax.f32 %v85_v45, 1e-06  ;;  %v88_v16 = vld [vmem:[#allocation4 + $0x1a8] sm:$0xff]  ;;  %v55_v24 = vld [vmem:[#allocation4 + $0xa0] sm:$0xff] }
  0x51   :  { %v214_v60 = vmax.f32 %v86_v46, 1e-06  ;;  %v435_v61 = vmul.f32 %v307_v43, %v179_v33  ;;  %v436_v62 = vmul.f32 %v308_v44, %v180_v34  ;;  %v371_v63 = vmul.f32 %v243_v47, %v243_v47  ;;  %v151_v33 = vld [vmem:[#allocation4 + $0x3a0] sm:$0xff]  ;;  %v152_v34 = vld [vmem:[#allocation4 + $0x3a8] sm:$0xff] }
  0x52   :  { %663 = vadd.xlane.f32.xlu0 %v662_v27  ;;  %v372_v0 = vmul.f32 %v244_v55, %v244_v55  ;;  %v665_v3 = vadd.f32 %v498_v51, %v497_v50  ;;  %v181_v4 = vmax.f32 %v53_v56, 1e-06  ;;  %v182_v5 = vmax.f32 %v54_v57, 1e-06  ;;  %v119_v42 = vld [vmem:[#allocation4 + $0x2a0] sm:$0xff]  ;;  %v120_v43 = vld [vmem:[#allocation4 + $0x2a8] sm:$0xff] }
  0x53   :  { %v620_v6 = vadd.f32 %v468_v52, %v467_v49  ;;  %v531_v7 = vmul.f32 %v403_v53, %v275_v37  ;;  %v532_v8 = vmul.f32 %v404_v54, %v276_v38  ;;  %v341_v11 = vmul.f32 %v213_v59, %v213_v59  ;;  %v89_v53 = vld [vmem:[#allocation4 + $0x1b0] sm:$0xff]  ;;  %v90_v54 = vld [vmem:[#allocation4 + $0x1b8] sm:$0xff] }
  0x54   :  { %618 = vadd.xlane.f32.xlu1 %v617_v39  ;;  %v342_v12 = vmul.f32 %v214_v60, %v214_v60  ;;  %v277_v13 = vmax.f32 %v149_v1, 1e-06  ;;  %v278_v14 = vmax.f32 %v150_v2, 1e-06  ;;  %v572_v17 = vadd.f32 %v436_v62, %v435_v61  ;;  %v58_v1 = vld [vmem:[#allocation4 + $0xb8] sm:$0xff] }
  0x55   :  { %v499_v18 = vmul.f32 %v371_v63, %v243_v47  ;;  %v500_v19 = vmul.f32 %v372_v0, %v244_v55  ;;  %v309_v20 = vmul.f32 %v181_v4, %v181_v4  ;;  %v310_v21 = vmul.f32 %v182_v5, %v182_v5  ;;  %v57_v0 = vld [vmem:[#allocation4 + $0xb0] sm:$0xff] }
  0x56   :  { %570 = vadd.xlane.f32.xlu0 %v569_v48  ;;  %v245_v22 = vmax.f32 %v117_v9, 1e-06  ;;  %v246_v23 = vmax.f32 %v118_v10, 1e-06  ;;  %v716_v26 = vadd.f32 %v532_v8, %v531_v7  ;;  %v215_v27 = vmax.f32 %v87_v15, 1e-06 }
  0x57   :  { %v216_v28 = vmax.f32 %v88_v16, 1e-06  ;;  %v469_v29 = vmul.f32 %v341_v11, %v213_v59  ;;  %v470_v30 = vmul.f32 %v342_v12, %v214_v60  ;;  %v405_v31 = vmul.f32 %v277_v13, %v277_v13  ;;  %v153_v9 = vld [vmem:[#allocation4 + $0x3b0] sm:$0xff]  ;;  %v154_v10 = vld [vmem:[#allocation4 + $0x3b8] sm:$0xff] }
  0x58   :  { %714 = vadd.xlane.f32.xlu1 %v713_v58  ;;  %v406_v32 = vmul.f32 %v278_v14, %v278_v14  ;;  %v668_v35 = vadd.f32 %v500_v19, %v499_v18  ;;  %v183_v36 = vmax.f32 %v55_v24, 1e-06  ;;  %v184_v37 = vmax.f32 %v56_v25, 1e-06  ;;  %v122_v18 = vld [vmem:[#allocation4 + $0x2b8] sm:$0xff]  ;;  %v92_v24 = vld [vmem:[#allocation4 + $0x1c8] sm:$0xff] }
  0x59   :  { %v437_v38 = vmul.f32 %v309_v20, %v181_v4  ;;  %v438_v39 = vmul.f32 %v310_v21, %v182_v5  ;;  %v373_v40 = vmul.f32 %v245_v22, %v245_v22  ;;  %v374_v41 = vmul.f32 %v246_v23, %v246_v23 }
  0x5a   :  { %666 = vadd.xlane.f32.xlu0 %v665_v3  ;;  %v343_v44 = vmul.f32 %v215_v27, %v215_v27  ;;  %v344_v45 = vmul.f32 %v216_v28, %v216_v28  ;;  %v279_v46 = vmax.f32 %v151_v33, 1e-06  ;;  %v280_v47 = vmax.f32 %v152_v34, 1e-06  ;;  %v60_v33 = vld [vmem:[#allocation4 + $0xc8] sm:$0xff] }
  0x5b   :  { %v623_v48 = vadd.f32 %v470_v30, %v469_v29  ;;  %v533_v49 = vmul.f32 %v405_v31, %v277_v13  ;;  %v534_v50 = vmul.f32 %v406_v32, %v278_v14  ;;  %v311_v51 = vmul.f32 %v183_v36, %v183_v36  ;;  %v59_v32 = vld [vmem:[#allocation4 + $0xc0] sm:$0xff] }
  0x5c   :  { %621 = vadd.xlane.f32.xlu1 %v620_v6  ;;  %v312_v52 = vmul.f32 %v184_v37, %v184_v37  ;;  %v247_v55 = vmax.f32 %v119_v42, 1e-06  ;;  %v248_v56 = vmax.f32 %v120_v43, 1e-06  ;;  %v575_v57 = vadd.f32 %v438_v39, %v437_v38  ;;  %v156_v42 = vld [vmem:[#allocation4 + $0x3c8] sm:$0xff] }
  0x5d   :  { %v501_v58 = vmul.f32 %v373_v40, %v245_v22  ;;  %v502_v59 = vmul.f32 %v374_v41, %v246_v23  ;;  %v471_v60 = vmul.f32 %v343_v44, %v215_v27  ;;  %v472_v61 = vmul.f32 %v344_v45, %v216_v28  ;;  %v91_v23 = vld [vmem:[#allocation4 + $0x1c0] sm:$0xff] }
  0x5e   :  { %573 = vadd.xlane.f32.xlu0 %v572_v17  ;;  %v407_v62 = vmul.f32 %v279_v46, %v279_v46  ;;  %v408_v63 = vmul.f32 %v280_v47, %v280_v47  ;;  %v719_v2 = vadd.f32 %v534_v50, %v533_v49  ;;  %v217_v3 = vmax.f32 %v89_v53, 1e-06  ;;  %v121_v17 = vld [vmem:[#allocation4 + $0x2b0] sm:$0xff]  ;;  %v155_v41 = vld [vmem:[#allocation4 + $0x3c0] sm:$0xff] }
  0x5f   :  { %v218_v4 = vmax.f32 %v90_v54, 1e-06  ;;  %v439_v5 = vmul.f32 %v311_v51, %v183_v36  ;;  %v440_v6 = vmul.f32 %v312_v52, %v184_v37  ;;  %v375_v7 = vmul.f32 %v247_v55, %v247_v55  ;;  %v123_v50 = vld [vmem:[#allocation4 + $0x2c0] sm:$0xff]  ;;  %v124_v51 = vld [vmem:[#allocation4 + $0x2c8] sm:$0xff] }
  0x60   :  { %717 = vadd.xlane.f32.xlu1 %v716_v26  ;;  %v376_v8 = vmul.f32 %v248_v56, %v248_v56  ;;  %v671_v11 = vadd.f32 %v502_v59, %v501_v58  ;;  %v185_v12 = vmax.f32 %v57_v0, 1e-06  ;;  %v186_v13 = vmax.f32 %v58_v1, 1e-06 }
  0x61   :  { %v626_v14 = vadd.f32 %v472_v61, %v471_v60  ;;  %v535_v15 = vmul.f32 %v407_v62, %v279_v46  ;;  %v536_v16 = vmul.f32 %v408_v63, %v280_v47  ;;  %v345_v19 = vmul.f32 %v217_v3, %v217_v3  ;;  %v93_v61 = vld [vmem:[#allocation4 + $0x1d0] sm:$0xff]  ;;  %v94_v62 = vld [vmem:[#allocation4 + $0x1d8] sm:$0xff] }
  0x62   :  { %669 = vadd.xlane.f32.xlu0 %v668_v35  ;;  %v346_v20 = vmul.f32 %v218_v4, %v218_v4  ;;  %v281_v21 = vmax.f32 %v153_v9, 1e-06  ;;  %v282_v22 = vmax.f32 %v154_v10, 1e-06  ;;  %v578_v25 = vadd.f32 %v440_v6, %v439_v5  ;;  %v62_v9 = vld [vmem:[#allocation4 + $0xd8] sm:$0xff] }
  0x63   :  { %v503_v26 = vmul.f32 %v375_v7, %v247_v55  ;;  %v504_v27 = vmul.f32 %v376_v8, %v248_v56  ;;  %v313_v28 = vmul.f32 %v185_v12, %v185_v12  ;;  %v314_v29 = vmul.f32 %v186_v13, %v186_v13  ;;  %v61_v8 = vld [vmem:[#allocation4 + $0xd0] sm:$0xff] }
  0x64   :  { %624 = vadd.xlane.f32.xlu1 %v623_v48  ;;  %v249_v30 = vmax.f32 %v121_v17, 1e-06  ;;  %v250_v31 = vmax.f32 %v122_v18, 1e-06  ;;  %v722_v34 = vadd.f32 %v536_v16, %v535_v15  ;;  %v219_v35 = vmax.f32 %v91_v23, 1e-06 }
  0x65   :  { %v220_v36 = vmax.f32 %v92_v24, 1e-06  ;;  %v473_v37 = vmul.f32 %v345_v19, %v217_v3  ;;  %v474_v38 = vmul.f32 %v346_v20, %v218_v4  ;;  %v409_v39 = vmul.f32 %v281_v21, %v281_v21  ;;  %v157_v17 = vld [vmem:[#allocation4 + $0x3d0] sm:$0xff]  ;;  %v158_v18 = vld [vmem:[#allocation4 + $0x3d8] sm:$0xff] }
  0x66   :  { %576 = vadd.xlane.f32.xlu0 %v575_v57  ;;  %v410_v40 = vmul.f32 %v282_v22, %v282_v22  ;;  %v674_v43 = vadd.f32 %v504_v27, %v503_v26  ;;  %v187_v44 = vmax.f32 %v59_v32, 1e-06  ;;  %v188_v45 = vmax.f32 %v60_v33, 1e-06  ;;  %v126_v26 = vld [vmem:[#allocation4 + $0x2d8] sm:$0xff]  ;;  %v96_v32 = vld [vmem:[#allocation4 + $0x1e8] sm:$0xff] }
  0x67   :  { %v441_v46 = vmul.f32 %v313_v28, %v185_v12  ;;  %v442_v47 = vmul.f32 %v314_v29, %v186_v13  ;;  %v377_v48 = vmul.f32 %v249_v30, %v249_v30  ;;  %v378_v49 = vmul.f32 %v250_v31, %v250_v31 }
  0x68   :  { %720 = vadd.xlane.f32.xlu1 %v719_v2  ;;  %v347_v52 = vmul.f32 %v219_v35, %v219_v35  ;;  %v348_v53 = vmul.f32 %v220_v36, %v220_v36  ;;  %v283_v54 = vmax.f32 %v155_v41, 1e-06  ;;  %v284_v55 = vmax.f32 %v156_v42, 1e-06  ;;  %v64_v41 = vld [vmem:[#allocation4 + $0xe8] sm:$0xff] }
  0x69   :  { %v629_v56 = vadd.f32 %v474_v38, %v473_v37  ;;  %v537_v57 = vmul.f32 %v409_v39, %v281_v21  ;;  %v538_v58 = vmul.f32 %v410_v40, %v282_v22  ;;  %v315_v59 = vmul.f32 %v187_v44, %v187_v44  ;;  %v63_v40 = vld [vmem:[#allocation4 + $0xe0] sm:$0xff] }
  0x6a   :  { %672 = vadd.xlane.f32.xlu0 %v671_v11  ;;  %v316_v60 = vmul.f32 %v188_v45, %v188_v45  ;;  %v251_v63 = vmax.f32 %v123_v50, 1e-06  ;;  %v252_v0 = vmax.f32 %v124_v51, 1e-06  ;;  %v581_v1 = vadd.f32 %v442_v47, %v441_v46  ;;  %v160_v50 = vld [vmem:[#allocation4 + $0x3e8] sm:$0xff] }
  0x6b   :  { %v505_v2 = vmul.f32 %v377_v48, %v249_v30  ;;  %v506_v3 = vmul.f32 %v378_v49, %v250_v31  ;;  %v475_v4 = vmul.f32 %v347_v52, %v219_v35  ;;  %v476_v5 = vmul.f32 %v348_v53, %v220_v36  ;;  %v95_v31 = vld [vmem:[#allocation4 + $0x1e0] sm:$0xff] }
  0x6c   :  { %627 = vadd.xlane.f32.xlu1 %v626_v14  ;;  %v411_v6 = vmul.f32 %v283_v54, %v283_v54  ;;  %v412_v7 = vmul.f32 %v284_v55, %v284_v55  ;;  %v725_v10 = vadd.f32 %v538_v58, %v537_v57  ;;  %v221_v11 = vmax.f32 %v93_v61, 1e-06  ;;  %v159_v49 = vld [vmem:[#allocation4 + $0x3e0] sm:$0xff] }
  0x6d   :  { %v222_v12 = vmax.f32 %v94_v62, 1e-06  ;;  %v443_v13 = vmul.f32 %v315_v59, %v187_v44  ;;  %v444_v14 = vmul.f32 %v316_v60, %v188_v45  ;;  %v379_v15 = vmul.f32 %v251_v63, %v251_v63  ;;  %v127_v58 = vld [vmem:[#allocation4 + $0x2e0] sm:$0xff] }
  0x6e   :  { %579 = vadd.xlane.f32.xlu0 %v578_v25  ;;  %v380_v16 = vmul.f32 %v252_v0, %v252_v0  ;;  %v677_v19 = vadd.f32 %v506_v3, %v505_v2  ;;  %v189_v20 = vmax.f32 %v61_v8, 1e-06  ;;  %v190_v21 = vmax.f32 %v62_v9, 1e-06  ;;  %v125_v25 = vld [vmem:[#allocation4 + $0x2d0] sm:$0xff] }
  0x6f   :  { %v632_v22 = vadd.f32 %v476_v5, %v475_v4  ;;  %v539_v23 = vmul.f32 %v411_v6, %v283_v54  ;;  %v540_v24 = vmul.f32 %v412_v7, %v284_v55  ;;  %v349_v27 = vmul.f32 %v221_v11, %v221_v11  ;;  %v97_v5 = vld [vmem:[#allocation4 + $0x1f0] sm:$0xff]  ;;  %v98_v6 = vld [vmem:[#allocation4 + $0x1f8] sm:$0xff] }
  0x70   :  { %723 = vadd.xlane.f32.xlu1 %v722_v34  ;;  %v350_v28 = vmul.f32 %v222_v12, %v222_v12  ;;  %v285_v29 = vmax.f32 %v157_v17, 1e-06  ;;  %v286_v30 = vmax.f32 %v158_v18, 1e-06  ;;  %v584_v33 = vadd.f32 %v444_v14, %v443_v13  ;;  %v66_v17 = vld [vmem:[#allocation4 + $0xf8] sm:$0xff] }
  0x71   :  { %v507_v34 = vmul.f32 %v379_v15, %v251_v63  ;;  %v508_v35 = vmul.f32 %v380_v16, %v252_v0  ;;  %v317_v36 = vmul.f32 %v189_v20, %v189_v20  ;;  %v318_v37 = vmul.f32 %v190_v21, %v190_v21  ;;  %v128_v63 = vld [vmem:[#allocation4 + $0x2e8] sm:$0xff]  ;;  %v65_v16 = vld [vmem:[#allocation4 + $0xf0] sm:$0xff] }
  0x72   :  { %675 = vadd.xlane.f32.xlu0 %v674_v43  ;;  %v253_v38 = vmax.f32 %v125_v25, 1e-06  ;;  %v254_v39 = vmax.f32 %v126_v26, 1e-06  ;;  %v728_v42 = vadd.f32 %v540_v24, %v539_v23  ;;  %v223_v43 = vmax.f32 %v95_v31, 1e-06 }
  0x73   :  { %v224_v44 = vmax.f32 %v96_v32, 1e-06  ;;  %v477_v45 = vmul.f32 %v349_v27, %v221_v11  ;;  %v478_v46 = vmul.f32 %v350_v28, %v222_v12  ;;  %v413_v47 = vmul.f32 %v285_v29, %v285_v29  ;;  %v161_v24 = vld [vmem:[#allocation4 + $0x3f0] sm:$0xff]  ;;  %v162_v25 = vld [vmem:[#allocation4 + $0x3f8] sm:$0xff] }
  0x74   :  { %630 = vadd.xlane.f32.xlu1 %v629_v56  ;;  %v414_v48 = vmul.f32 %v286_v30, %v286_v30  ;;  %v680_v51 = vadd.f32 %v508_v35, %v507_v34  ;;  %v191_v52 = vmax.f32 %v63_v40, 1e-06  ;;  %v192_v53 = vmax.f32 %v64_v41, 1e-06  ;;  %v130_v34 = vld [vmem:[#allocation4 + $0x2f8] sm:$0xff] }
  0x75   :  { %v445_v54 = vmul.f32 %v317_v36, %v189_v20  ;;  %v446_v55 = vmul.f32 %v318_v37, %v190_v21  ;;  %v381_v56 = vmul.f32 %v253_v38, %v253_v38  ;;  %v382_v57 = vmul.f32 %v254_v39, %v254_v39 }
  0x76   :  { %582 = vadd.xlane.f32.xlu0 %v581_v1  ;;  %v351_v59 = vmul.f32 %v223_v43, %v223_v43  ;;  %v352_v60 = vmul.f32 %v224_v44, %v224_v44  ;;  %v287_v61 = vmax.f32 %v159_v49, 1e-06  ;;  %v288_v62 = vmax.f32 %v160_v50, 1e-06 }
  0x77   :  { %v635_v0 = vadd.f32 %v478_v46, %v477_v45  ;;  %v541_v1 = vmul.f32 %v413_v47, %v285_v29  ;;  %v542_v2 = vmul.f32 %v414_v48, %v286_v30  ;;  %v319_v3 = vmul.f32 %v191_v52, %v191_v52  ;;  %v129_v30 = vld [vmem:[#allocation4 + $0x2f0] sm:$0xff] }
  0x78   :  { %726 = vadd.xlane.f32.xlu1 %v725_v10  ;;  %v320_v4 = vmul.f32 %v192_v53, %v192_v53  ;;  %v255_v7 = vmax.f32 %v127_v58, 1e-06  ;;  %v587_v8 = vadd.f32 %v446_v55, %v445_v54  ;;  %v509_v9 = vmul.f32 %v381_v56, %v253_v38 }
  0x79   :  { %v510_v10 = vmul.f32 %v382_v57, %v254_v39  ;;  %v256_v11 = vmax.f32 %v128_v63, 1e-06  ;;  %v479_v12 = vmul.f32 %v351_v59, %v223_v43  ;;  %v480_v13 = vmul.f32 %v352_v60, %v224_v44 }
  0x7a   :  { %678 = vadd.xlane.f32.xlu0 %v677_v19  ;;  %v415_v14 = vmul.f32 %v287_v61, %v287_v61  ;;  %v416_v15 = vmul.f32 %v288_v62, %v288_v62  ;;  %v731_v18 = vadd.f32 %v542_v2, %v541_v1  ;;  %v225_v19 = vmax.f32 %v97_v5, 1e-06 }
  0x7b   :  { %v226_v20 = vmax.f32 %v98_v6, 1e-06  ;;  %v447_v21 = vmul.f32 %v319_v3, %v191_v52  ;;  %v383_v23 = vmul.f32 %v255_v7, %v255_v7  ;;  %v683_v26 = vadd.f32 %v510_v10, %v509_v9 }
  0x7c   :  { %633 = vadd.xlane.f32.xlu1 %v632_v22  ;;  %v448_v22 = vmul.f32 %v320_v4, %v192_v53  ;;  %v384_v27 = vmul.f32 %v256_v11, %v256_v11  ;;  %v193_v28 = vmax.f32 %v65_v16, 1e-06  ;;  %v194_v29 = vmax.f32 %v66_v17, 1e-06 }
  0x7d   :  { %v638_v31 = vadd.f32 %v480_v13, %v479_v12  ;;  %v543_v32 = vmul.f32 %v415_v14, %v287_v61  ;;  %v353_v35 = vmul.f32 %v225_v19, %v225_v19  ;;  %v354_v36 = vmul.f32 %v226_v20, %v226_v20 }
  0x7e   :  { %585 = vadd.xlane.f32.xlu0 %v584_v33  ;;  %v544_v33 = vmul.f32 %v416_v15, %v288_v62  ;;  %v289_v37 = vmax.f32 %v161_v24, 1e-06  ;;  %v290_v38 = vmax.f32 %v162_v25, 1e-06  ;;  %v4543_v39 = vmov 0  }
  0x7f   :  { %4486 = vset.pattern.permute.xlu0 %v4543_v39  ;;  %v590_v40 = vadd.f32 %v448_v22, %v447_v21  ;;  %v511_v41 = vmul.f32 %v383_v23, %v255_v7  ;;  %4487 = vset.pattern.permute.xlu1 %v4543_v39  ;;  %v512_v43 = vmul.f32 %v384_v27, %v256_v11  ;;  %v258_v46 = vmax.f32 %v130_v34, 1e-06 }
  0x80   :  { %729 = vadd.xlane.f32.xlu1 %v728_v42  ;;  %v257_v42 = vmax.f32 %v129_v30, 1e-06  ;;  %v321_v44 = vmul.f32 %v193_v28, %v193_v28  ;;  %v322_v45 = vmul.f32 %v194_v29, %v194_v29  ;;  %v734_v47 = vadd.f32 %v544_v33, %v543_v32 }
  0x81   :  { %v481_v48 = vmul.f32 %v353_v35, %v225_v19  ;;  %v482_v49 = vmul.f32 %v354_v36, %v226_v20  ;;  %v417_v50 = vmul.f32 %v289_v37, %v289_v37  ;;  %v686_v53 = vadd.f32 %v512_v43, %v511_v41 }
  0x82   :  { %681 = vadd.xlane.f32.xlu0 %v680_v51  ;;  %v418_v51 = vmul.f32 %v290_v38, %v290_v38  ;;  %v385_v52 = vmul.f32 %v257_v42, %v257_v42  ;;  %v449_v54 = vmul.f32 %v321_v44, %v193_v28  ;;  %v450_v55 = vmul.f32 %v322_v45, %v194_v29 }
  0x83   :  { %v386_v56 = vmul.f32 %v258_v46, %v258_v46  ;;  %v641_v57 = vadd.f32 %v482_v49, %v481_v48  ;;  %v545_v58 = vmul.f32 %v417_v50, %v289_v37  ;;  %v4544_v1 = vmov 269488144  }
  0x84   :  { %636 = vadd.xlane.f32.xlu1 %v635_v0  ;;  %v546_v59 = vmul.f32 %v418_v51, %v290_v38  ;;  %v593_v60 = vadd.f32 %v450_v55, %v449_v54  ;;  %v513_v61 = vmul.f32 %v385_v52, %v257_v42  ;;  %v805_v2 = vunpack.c.l.s4 %v4544_v1 }
  0x85   :  { %v514_v62 = vmul.f32 %v386_v56, %v258_v46  ;;  %v807_v3 = vlaneseq  ;;  %v4545_v4 = vmov 842150450   ;;  %v4546_v6 = vmov 1414812756  }
  0x86   :  { %588 = vadd.xlane.f32.xlu0 %v587_v8  ;;  %v737_v63 = vadd.f32 %v546_v59, %v545_v58  ;;  %v812_v5 = vunpack.c.l.s4 %v4545_v4  ;;  %v819_v7 = vunpack.c.l.s4 %v4546_v6  ;;  %v4547_v8 = vmov 1987475062  }
  0x87   :  { %v689_v0 = vadd.f32 %v514_v62, %v513_v61  ;;  %v826_v9 = vunpack.c.l.s4 %v4547_v8  ;;  %v806_v10 = vunpack.c.0.s8 %v805_v2  ;;  %v4587_v11 = vshrl.u32 %v807_v3, 7 }
  0x88   :  { %732 = vadd.xlane.f32.xlu1 %v731_v18  ;;  %v813_v12 = vunpack.c.0.s8 %v812_v5  ;;  %v820_v13 = vunpack.c.0.s8 %v819_v7  ;;  %v4548_v15 = vmov 1983009808   ;;  %vm3901_vm2 = vcmask 261312  }
  0x89   :  { %v827_v14 = vunpack.c.0.s8 %v826_v9  ;;  %v2599_v16 = vunpack.c.l.s4 %v4548_v15  ;;  %v4590_v17 = vsub.s32 %v806_v10, %v4587_v11  ;;  %vm3908_vm3 = vcmask 326912  }
  0x8a   :  { %684 = vadd.xlane.f32.xlu0 %v683_v26  ;;  %v4593_v18 = vsub.s32 %v813_v12, %v4587_v11  ;;  %v4596_v19 = vsub.s32 %v820_v13, %v4587_v11  ;;  %vm3915_vm4 = vcmask 392512   ;;  %vm3922_vm5 = vcmask 458112  }
  0x8b   :  { %v4599_v20 = vsub.s32 %v827_v14, %v4587_v11  ;;  %v2600_v21 = vunpack.c.0.s8 %v2599_v16  ;;  %vm3929_vm6 = vcmask 523712   ;;  %vm3936_vm7 = vcmask 589312  }
  0x8c   :  { %639 = vadd.xlane.f32.xlu1 %v638_v31  ;;  %vm3943_vm8 = vcmask 654912   ;;  %vm3950_vm9 = vcmask 720512   ;;  %vm3957_vm10 = vcmask 786112   ;;  %vm3964_vm11 = vcmask 851712  }
  0x8d   :  { %v4610_v32 = vsub.s32 %v2600_v21, %v4587_v11  ;;  %vm3971_vm12 = vcmask 917312   ;;  %vm3978_vm13 = vcmask 982912   ;;  %vm3985_vm14 = vcmask 1048512  }
  0x8e   :  { %591 = vadd.xlane.f32.xlu0 %v590_v40  ;;  %vm4224_vm15 = vcmask 1041409  }
  0x90   :  { %735 = vadd.xlane.f32.xlu1 %v734_v47 }
  0x92   :  { %687 = vadd.xlane.f32.xlu0 %v686_v53 }
  0x94   :  { %642 = vadd.xlane.f32.xlu1 %v641_v57 }
  0x96   :  { %594 = vadd.xlane.f32.xlu0 %v593_v60 }
  0x98   :  { %738 = vadd.xlane.f32.xlu1 %v737_v63 }
  0x9a   :  { %690 = vadd.xlane.f32.xlu0 %v689_v0 }
  0xa9   :  { %v598_v22 = vpop.xlane.xlu1 %597 }
  0xaa   :  { %v1258_v23 = vrot.slane %v598_v22, %v4590_v17  ;;  %v1265_v24 = vrot.slane %v598_v22, %v4593_v18  ;;  %v1272_v25 = vrot.slane %v598_v22, %v4596_v19  ;;  %v1279_v26 = vrot.slane %v598_v22, %v4599_v20  ;;  %v550_v27 = vpop.xlane.xlu0 %549 }
  0xab   :  { %v810_v28 = vrot.slane %v550_v27, %v4590_v17  ;;  %v817_v29 = vrot.slane %v550_v27, %v4593_v18  ;;  %v824_v30 = vrot.slane %v550_v27, %v4596_v19  ;;  %v831_v31 = vrot.slane %v550_v27, %v4599_v20 }
  0xac   :  { %v2868_v33 = vcombine.low %v1258_v23, %v1265_v24  ;;  %v2869_v37 = vcombine.low %v1272_v25, %v1279_v26 }
  0xad   :  { %v601_v34 = vpop.xlane.xlu1 %600  ;;  %v2596_v35 = vcombine.low %v810_v28, %v817_v29  ;;  %v2597_v36 = vcombine.low %v824_v30, %v831_v31 }
  0xae   :  { %v1286_v38 = vrot.slane %v601_v34, %v4590_v17  ;;  %v1293_v39 = vrot.slane %v601_v34, %v4593_v18  ;;  %v1300_v40 = vrot.slane %v601_v34, %v4596_v19  ;;  %v1307_v41 = vrot.slane %v601_v34, %v4599_v20  ;;  %v553_v42 = vpop.xlane.xlu0 %552 }
  0xaf   :  { %v838_v43 = vrot.slane %v553_v42, %v4590_v17  ;;  %v845_v44 = vrot.slane %v553_v42, %v4593_v18  ;;  %v852_v45 = vrot.slane %v553_v42, %v4596_v19  ;;  %v859_v46 = vrot.slane %v553_v42, %v4599_v20 }
  0xb0   :  { %v2604_v47 = vrot.slane %v2596_v35, %v4610_v32  ;;  %v2611_v48 = vrot.slane %v2597_v36, %v4610_v32  ;;  %v2876_v49 = vrot.slane %v2868_v33, %v4610_v32  ;;  %v2883_v53 = vrot.slane %v2869_v37, %v4610_v32 }
  0xb1   :  { %v649_v50 = vpop.xlane.xlu1 %648  ;;  %v2613_v51 = vcombine.low %v838_v43, %v845_v44  ;;  %v2614_v52 = vcombine.low %v852_v45, %v859_v46  ;;  %v2885_v54 = vcombine.low %v1286_v38, %v1293_v39  ;;  %v2886_v59 = vcombine.low %v1300_v40, %v1307_v41 }
  0xb2   :  { %v1734_v55 = vrot.slane %v649_v50, %v4590_v17  ;;  %v1741_v56 = vrot.slane %v649_v50, %v4593_v18  ;;  %v1748_v57 = vrot.slane %v649_v50, %v4596_v19  ;;  %v646_v58 = vpop.xlane.xlu0 %645  ;;  %v2612_v60 = vcombine.low %v2604_v47, %v2611_v48 }
  0xb3   :  { %v2621_v61 = vrot.slane %v2613_v51, %v4610_v32  ;;  %v2628_v62 = vrot.slane %v2614_v52, %v4610_v32  ;;  %v1706_v63 = vrot.slane %v646_v58, %v4590_v17  ;;  %v1755_v0 = vrot.slane %v649_v50, %v4599_v20 }
  0xb4   :  { %v1713_v1 = vrot.slane %v646_v58, %v4593_v18  ;;  %v1720_v2 = vrot.slane %v646_v58, %v4596_v19  ;;  %v1727_v4 = vrot.slane %v646_v58, %v4599_v20  ;;  %3685 = vperm.xlu0 %4486, %v2612_v60   ;;  %v2884_v7 = vcombine.low %v2876_v49, %v2883_v53 }
  0xb5   :  { %v4634_v5 = vpop.xlane.xlu1 %696  ;;  %v2629_v6 = vcombine.low %v2621_v61, %v2628_v62  ;;  %v2893_v9 = vrot.slane %v2885_v54, %v4610_v32  ;;  %v2900_v10 = vrot.slane %v2886_v59, %v4610_v32  ;;  %v3157_v16 = vcombine.low %v1734_v55, %v1741_v56 }
  0xb6   :  { %v3140_v12 = vcombine.low %v1706_v63, %v1713_v1  ;;  %v3141_v13 = vcombine.low %v1720_v2, %v1727_v4  ;;  %v3158_v21 = vcombine.low %v1748_v57, %v1755_v0  ;;  %v2182_v34 = vrot.slane %v4634_v5, %v4590_v17 }
  0xb7   :  { %3688 = vperm.xlu1 %4487, %v2629_v6   ;;  %v694_v8 = vpop.xlane.xlu0 %693  ;;  %v2901_v29 = vcombine.low %v2893_v9, %v2900_v10  ;;  %v3165_v35 = vrot.slane %v3157_v16, %v4610_v32  ;;  %v2189_v38 = vrot.slane %v4634_v5, %v4593_v18  ;;  %v2196_v47 = vrot.slane %v4634_v5, %v4596_v19 }
  0xb8   :  { %v2154_v14 = vrot.slane %v694_v8, %v4590_v17  ;;  %v2161_v15 = vrot.slane %v694_v8, %v4593_v18  ;;  %v2168_v23 = vrot.slane %v694_v8, %v4596_v19  ;;  %v2175_v24 = vrot.slane %v694_v8, %v4599_v20 }
  0xb9   :  { %v604_v22 = vpop.xlane.xlu1 %603  ;;  %v3148_v31 = vrot.slane %v3140_v12, %v4610_v32  ;;  %v3155_v33 = vrot.slane %v3141_v13, %v4610_v32  ;;  %v3172_v36 = vrot.slane %v3158_v21, %v4610_v32  ;;  %v2203_v52 = vrot.slane %v4634_v5, %v4599_v20 }
  0xba   :  { %v1314_v25 = vrot.slane %v604_v22, %v4590_v17  ;;  %v1321_v26 = vrot.slane %v604_v22, %v4593_v18  ;;  %v1328_v27 = vrot.slane %v604_v22, %v4596_v19  ;;  %v1335_v28 = vrot.slane %v604_v22, %v4599_v20 }
  0xbb   :  { %3733 = vperm.xlu1 %4487, %v2884_v7   ;;  %v4646_v30 = vpop.xlane.xlu0 %555  ;;  %v3412_v37 = vcombine.low %v2154_v14, %v2161_v15  ;;  %v3413_v42 = vcombine.low %v2168_v23, %v2175_v24  ;;  %v3156_v50 = vcombine.low %v3148_v31, %v3155_v33  ;;  %v3173_v54 = vcombine.low %v3165_v35, %v3172_v36 }
  0xbc   :  { %v2902_v40 = vcombine.low %v1314_v25, %v1321_v26  ;;  %v2903_v41 = vcombine.low %v1328_v27, %v1335_v28  ;;  %v866_v53 = vrot.slane %v4646_v30, %v4590_v17  ;;  %v873_v1 = vrot.slane %v4646_v30, %v4593_v18 }
  0xbd   :  { %v700_v39 = vpop.xlane.xlu1 %699  ;;  %v3420_v55 = vrot.slane %v3412_v37, %v4610_v32  ;;  %v3427_v60 = vrot.slane %v3413_v42, %v4610_v32  ;;  %v880_v6 = vrot.slane %v4646_v30, %v4596_v19  ;;  %v887_v7 = vrot.slane %v4646_v30, %v4599_v20 }
  0xbe   :  { %v2210_v43 = vrot.slane %v700_v39, %v4590_v17  ;;  %v2217_v44 = vrot.slane %v700_v39, %v4593_v18  ;;  %v2224_v45 = vrot.slane %v700_v39, %v4596_v19  ;;  %v2231_v46 = vrot.slane %v700_v39, %v4599_v20 }
  0xbf   :  { %3736 = vperm.xlu1 %4487, %v2901_v29   ;;  %v2910_v48 = vrot.slane %v2902_v40, %v4610_v32  ;;  %v2917_v49 = vrot.slane %v2903_v41, %v4610_v32  ;;  %v4664_v51 = vpop.xlane.xlu0 %651  ;;  %v3429_v8 = vcombine.low %v2182_v34, %v2189_v38  ;;  %v3430_v9 = vcombine.low %v2196_v47, %v2203_v52 }
  0xc0   :  { %v3446_v58 = vcombine.low %v2210_v43, %v2217_v44  ;;  %v3447_v59 = vcombine.low %v2224_v45, %v2231_v46  ;;  %v3428_v15 = vcombine.low %v3420_v55, %v3427_v60  ;;  %v1762_v24 = vrot.slane %v4664_v51, %v4590_v17 }
  0xc1   :  { %v607_v56 = vpop.xlane.xlu1 %606  ;;  %v2918_v57 = vcombine.low %v2910_v48, %v2917_v49  ;;  %v1769_v28 = vrot.slane %v4664_v51, %v4593_v18  ;;  %v1776_v29 = vrot.slane %v4664_v51, %v4596_v19  ;;  %v3437_v30 = vrot.slane %v3429_v8, %v4610_v32 }
  0xc2   :  { %v1342_v61 = vrot.slane %v607_v56, %v4590_v17  ;;  %v1349_v62 = vrot.slane %v607_v56, %v4593_v18  ;;  %v1356_v63 = vrot.slane %v607_v56, %v4596_v19  ;;  %v1363_v0 = vrot.slane %v607_v56, %v4599_v20 }
  0xc3   :  { %3739 = vperm.xlu0 %4486, %v2918_v57   ;;  %3781 = vperm.xlu1 %4487, %v3156_v50   ;;  %v3454_v2 = vrot.slane %v3446_v58, %v4610_v32  ;;  %v3461_v4 = vrot.slane %v3447_v59, %v4610_v32  ;;  %v4680_v5 = vpop.xlane.xlu0 %558  ;;  %v3444_v31 = vrot.slane %v3430_v9, %v4610_v32 }
  0xc4   :  { %v2919_v13 = vcombine.low %v1342_v61, %v1349_v62  ;;  %v2920_v14 = vcombine.low %v1356_v63, %v1363_v0  ;;  %v2630_v37 = vcombine.low %v866_v53, %v873_v1  ;;  %v2631_v45 = vcombine.low %v880_v6, %v887_v7 }
  0xc5   :  { %v703_v10 = vpop.xlane.xlu1 %702  ;;  %v3462_v12 = vcombine.low %v3454_v2, %v3461_v4  ;;  %v1783_v46 = vrot.slane %v4664_v51, %v4599_v20  ;;  %v894_v47 = vrot.slane %v4680_v5, %v4590_v17  ;;  %v901_v48 = vrot.slane %v4680_v5, %v4593_v18 }
  0xc6   :  { %v2238_v16 = vrot.slane %v703_v10, %v4590_v17  ;;  %v2245_v21 = vrot.slane %v703_v10, %v4593_v18  ;;  %v2252_v22 = vrot.slane %v703_v10, %v4596_v19  ;;  %v2259_v23 = vrot.slane %v703_v10, %v4599_v20 }
  0xc7   :  { %3835 = vperm.xlu0 %4486, %v3462_v12   ;;  %3784 = vperm.xlu1 %4487, %v3173_v54   ;;  %v2927_v25 = vrot.slane %v2919_v13, %v4610_v32  ;;  %v2934_v26 = vrot.slane %v2920_v14, %v4610_v32  ;;  %v4694_v27 = vpop.xlane.xlu0 %654  ;;  %v3445_v49 = vcombine.low %v3437_v30, %v3444_v31 }
  0xc8   :  { %v3463_v35 = vcombine.low %v2238_v16, %v2245_v21  ;;  %v3464_v36 = vcombine.low %v2252_v22, %v2259_v23  ;;  %v2638_v55 = vrot.slane %v2630_v37, %v4610_v32  ;;  %v2645_v61 = vrot.slane %v2631_v45, %v4610_v32 }
  0xc9   :  { %v610_v33 = vpop.xlane.xlu1 %609  ;;  %v2935_v34 = vcombine.low %v2927_v25, %v2934_v26  ;;  %v908_v63 = vrot.slane %v4680_v5, %v4596_v19  ;;  %v915_v0 = vrot.slane %v4680_v5, %v4599_v20  ;;  %v1790_v1 = vrot.slane %v4694_v27, %v4590_v17 }
  0xca   :  { %v1370_v38 = vrot.slane %v610_v33, %v4590_v17  ;;  %v1377_v39 = vrot.slane %v610_v33, %v4593_v18  ;;  %v1384_v40 = vrot.slane %v610_v33, %v4596_v19  ;;  %v1391_v41 = vrot.slane %v610_v33, %v4599_v20 }
  0xcb   :  { %3742 = vperm.xlu0 %4486, %v2935_v34   ;;  %3829 = vperm.xlu1 %4487, %v3428_v15   ;;  %v3471_v42 = vrot.slane %v3463_v35, %v4610_v32  ;;  %v3478_v43 = vrot.slane %v3464_v36, %v4610_v32  ;;  %v4708_v44 = vpop.xlane.xlu0 %561  ;;  %v1797_v2 = vrot.slane %v4694_v27, %v4593_v18 }
  0xcc   :  { %v2936_v53 = vcombine.low %v1370_v38, %v1377_v39  ;;  %v2937_v54 = vcombine.low %v1384_v40, %v1391_v41  ;;  %v2646_v7 = vcombine.low %v2638_v55, %v2645_v61  ;;  %v3174_v16 = vcombine.low %v1762_v24, %v1769_v28 }
  0xcd   :  { %v706_v50 = vpop.xlane.xlu1 %705  ;;  %v3479_v52 = vcombine.low %v3471_v42, %v3478_v43  ;;  %v1804_v22 = vrot.slane %v4694_v27, %v4596_v19  ;;  %v1811_v23 = vrot.slane %v4694_v27, %v4599_v20  ;;  %v922_v25 = vrot.slane %v4708_v44, %v4590_v17 }
  0xce   :  { %v2266_v56 = vrot.slane %v706_v50, %v4590_v17  ;;  %v2273_v57 = vrot.slane %v706_v50, %v4593_v18  ;;  %v2280_v58 = vrot.slane %v706_v50, %v4596_v19  ;;  %v2287_v51 = vrot.slane %v706_v50, %v4599_v20 }
  0xcf   :  { %3838 = vperm.xlu0 %4486, %v3479_v52   ;;  %3832 = vperm.xlu1 %4487, %v3445_v49   ;;  %v2944_v59 = vrot.slane %v2936_v53, %v4610_v32  ;;  %v2951_v60 = vrot.slane %v2937_v54, %v4610_v32  ;;  %v4724_v62 = vpop.xlane.xlu0 %657  ;;  %v3175_v26 = vcombine.low %v1776_v29, %v1783_v46 }
  0xd0   :  { %v3480_v8 = vcombine.low %v2266_v56, %v2273_v57  ;;  %v3481_v9 = vcombine.low %v2280_v58, %v2287_v51  ;;  %v929_v30 = vrot.slane %v4708_v44, %v4593_v18  ;;  %v3182_v34 = vrot.slane %v3174_v16, %v4610_v32 }
  0xd1   :  { %v613_v4 = vpop.xlane.xlu1 %612  ;;  %v2952_v6 = vcombine.low %v2944_v59, %v2951_v60  ;;  %v3189_v37 = vrot.slane %v3175_v26, %v4610_v32  ;;  %v2647_v39 = vcombine.low %v894_v47, %v901_v48  ;;  %v936_v41 = vrot.slane %v4708_v44, %v4596_v19 }
  0xd2   :  { %v1398_v10 = vrot.slane %v613_v4, %v4590_v17  ;;  %v1405_v12 = vrot.slane %v613_v4, %v4593_v18  ;;  %v1412_v13 = vrot.slane %v613_v4, %v4596_v19  ;;  %v1419_v14 = vrot.slane %v613_v4, %v4599_v20 }
  0xd3   :  { %3745 = vperm.xlu0 %4486, %v2952_v6   ;;  %3691 = vperm.xlu1 %4487, %v2646_v7   ;;  %v3488_v5 = vrot.slane %v3480_v8, %v4610_v32  ;;  %v3495_v15 = vrot.slane %v3481_v9, %v4610_v32  ;;  %v4740_v21 = vpop.xlane.xlu0 %564  ;;  %v943_v42 = vrot.slane %v4708_v44, %v4599_v20 }
  0xd4   :  { %v2953_v24 = vcombine.low %v1398_v10, %v1405_v12  ;;  %v2954_v29 = vcombine.low %v1412_v13, %v1419_v14  ;;  %v1818_v43 = vrot.slane %v4724_v62, %v4590_v17  ;;  %v2648_v45 = vcombine.low %v908_v63, %v915_v0 }
  0xd5   :  { %v709_v31 = vpop.xlane.xlu1 %708  ;;  %v3496_v33 = vcombine.low %v3488_v5, %v3495_v15  ;;  %v1825_v46 = vrot.slane %v4724_v62, %v4593_v18  ;;  %v3190_v49 = vcombine.low %v3182_v34, %v3189_v37  ;;  %v2655_v47 = vrot.slane %v2647_v39, %v4610_v32 }
  0xd6   :  { %v2294_v28 = vrot.slane %v709_v31, %v4590_v17  ;;  %v2301_v35 = vrot.slane %v709_v31, %v4593_v18  ;;  %v2308_v36 = vrot.slane %v709_v31, %v4596_v19  ;;  %v2315_v27 = vrot.slane %v709_v31, %v4599_v20 }
  0xd7   :  { %3841 = vperm.xlu0 %4486, %v3496_v33   ;;  %v2961_v38 = vrot.slane %v2953_v24, %v4610_v32  ;;  %v4757_v40 = vpop.xlane.xlu0 %660  ;;  %v2968_v52 = vrot.slane %v2954_v29, %v4610_v32  ;;  %v1832_v48 = vrot.slane %v4724_v62, %v4596_v19  ;;  %v1839_v53 = vrot.slane %v4724_v62, %v4599_v20 }
  0xd8   :  { %3787 = vperm.xlu1 %4487, %v3190_v49   ;;  %v2662_v56 = vrot.slane %v2648_v45, %v4610_v32  ;;  %v3497_v57 = vcombine.low %v2294_v28, %v2301_v35  ;;  %v3498_v58 = vcombine.low %v2308_v36, %v2315_v27  ;;  %v3191_v61 = vcombine.low %v1790_v1, %v1797_v2 }
  0xd9   :  { %v616_v50 = vpop.xlane.xlu1 %615  ;;  %v2969_v55 = vcombine.low %v2961_v38, %v2968_v52  ;;  %v3192_v63 = vcombine.low %v1804_v22, %v1811_v23  ;;  %v950_v0 = vrot.slane %v4740_v21, %v4590_v17  ;;  %v957_v9 = vrot.slane %v4740_v21, %v4593_v18 }
  0xda   :  { %v1426_v44 = vrot.slane %v616_v50, %v4590_v17  ;;  %v1433_v54 = vrot.slane %v616_v50, %v4593_v18  ;;  %v1440_v59 = vrot.slane %v616_v50, %v4596_v19  ;;  %v1447_v60 = vrot.slane %v616_v50, %v4599_v20 }
  0xdb   :  { %v568_v51 = vpop.xlane.xlu0 %567  ;;  %3748 = vperm.xlu0 %4486, %v2969_v55   ;;  %v2663_v4 = vcombine.low %v2655_v47, %v2662_v56  ;;  %v3505_v7 = vrot.slane %v3497_v57, %v4610_v32  ;;  %v3512_v8 = vrot.slane %v3498_v58, %v4610_v32  ;;  %v964_v10 = vrot.slane %v4740_v21, %v4596_v19 }
  0xdc   :  { %v971_v1 = vrot.slane %v4740_v21, %v4599_v20  ;;  %v1846_v2 = vrot.slane %v4757_v40, %v4590_v17  ;;  %v3199_v14 = vrot.slane %v3191_v61, %v4610_v32  ;;  %v3206_v5 = vrot.slane %v3192_v63, %v4610_v32 }
  0xdd   :  { %v712_v6 = vpop.xlane.xlu1 %711  ;;  %3694 = vperm.xlu1 %4487, %v2663_v4   ;;  %v3513_v13 = vcombine.low %v3505_v7, %v3512_v8  ;;  %v2970_v22 = vcombine.low %v1426_v44, %v1433_v54  ;;  %v2971_v23 = vcombine.low %v1440_v59, %v1447_v60  ;;  %v2664_v26 = vcombine.low %v922_v25, %v929_v30 }
  0xde   :  { %v2322_v12 = vrot.slane %v712_v6, %v4590_v17  ;;  %v2329_v16 = vrot.slane %v712_v6, %v4593_v18  ;;  %v2336_v31 = vrot.slane %v712_v6, %v4596_v19  ;;  %v2343_v33 = vrot.slane %v712_v6, %v4599_v20 }
  0xdf   :  { %v4793_v15 = vpop.xlane.xlu0 %663  ;;  %3844 = vperm.xlu0 %4486, %v3513_v13   ;;  %v3207_v34 = vcombine.low %v3199_v14, %v3206_v5  ;;  %v2665_v28 = vcombine.low %v936_v41, %v943_v42  ;;  %v978_v35 = vrot.slane %v568_v51, %v4590_v17  ;;  %v985_v36 = vrot.slane %v568_v51, %v4593_v18 }
  0xe0   :  { %v992_v27 = vrot.slane %v568_v51, %v4596_v19  ;;  %v999_v37 = vrot.slane %v568_v51, %v4599_v20  ;;  %v2978_v29 = vrot.slane %v2970_v22, %v4610_v32  ;;  %v2985_v25 = vrot.slane %v2971_v23, %v4610_v32 }
  0xe1   :  { %v619_v24 = vpop.xlane.xlu1 %618  ;;  %3790 = vperm.xlu1 %4487, %v3207_v34   ;;  %v2672_v30 = vrot.slane %v2664_v26, %v4610_v32  ;;  %v2679_v38 = vrot.slane %v2665_v28, %v4610_v32  ;;  %v1853_v41 = vrot.slane %v4757_v40, %v4593_v18  ;;  %v3514_v49 = vcombine.low %v2322_v12, %v2329_v16 }
  0xe2   :  { %v1454_v42 = vrot.slane %v619_v24, %v4590_v17  ;;  %v1461_v45 = vrot.slane %v619_v24, %v4593_v18  ;;  %v2986_v50 = vcombine.low %v2978_v29, %v2985_v25  ;;  %v3515_v44 = vcombine.low %v2336_v31, %v2343_v33 }
  0xe3   :  { %v4806_v39 = vpop.xlane.xlu0 %570  ;;  %v2680_v52 = vcombine.low %v2672_v30, %v2679_v38  ;;  %v3208_v54 = vcombine.low %v1818_v43, %v1825_v46  ;;  %v1860_v55 = vrot.slane %v4757_v40, %v4596_v19  ;;  %v1867_v56 = vrot.slane %v4757_v40, %v4599_v20 }
  0xe4   :  { %v4822_v57 = vcombine.low %v978_v35, %v985_v36  ;;  %v4824_v58 = vcombine.low %v992_v27, %v999_v37  ;;  %v1468_v51 = vrot.slane %v619_v24, %v4596_v19  ;;  %3751 = vperm.xlu0 %4486, %v2986_v50   ;;  %v1874_v59 = vrot.slane %v4793_v15, %v4590_v17 }
  0xe5   :  { %v715_v47 = vpop.xlane.xlu1 %714  ;;  %3697 = vperm.xlu1 %4487, %v2680_v52   ;;  %v3522_v60 = vrot.slane %v3514_v49, %v4610_v32  ;;  %v4833_v46 = vand.u32 127, %v807_v3  ;;  %v1475_v61 = vrot.slane %v619_v24, %v4599_v20  ;;  %v3529_v63 = vrot.slane %v3515_v44, %v4610_v32 }
  0xe6   :  { %v3209_v4 = vcombine.low %v1832_v48, %v1839_v53  ;;  %v3216_v6 = vrot.slane %v3208_v54, %v4610_v32  ;;  %v1881_v7 = vrot.slane %v4793_v15, %v4593_v18  ;;  %v1888_v3 = vrot.slane %v4793_v15, %v4596_v19 }
  0xe7   :  { %v4830_v43 = vpop.xlane.xlu0 %666  ;;  %v1895_v8 = vrot.slane %v4793_v15, %v4599_v20  ;;  %v2987_v13 = vcombine.low %v1454_v42, %v1461_v45  ;;  %v2350_v14 = vrot.slane %v715_v47, %v4590_v17  ;;  %v2357_v5 = vrot.slane %v715_v47, %v4593_v18 }
  0xe8   :  { %v3530_v62 = vcombine.low %v3522_v60, %v3529_v63  ;;  %v3223_v48 = vrot.slane %v3209_v4, %v4610_v32  ;;  %v2364_v53 = vrot.slane %v715_v47, %v4596_v19  ;;  %v2371_v16 = vrot.slane %v715_v47, %v4599_v20 }
  0xe9   :  { %v4850_v12 = vpop.xlane.xlu1 %621  ;;  %v1006_v22 = vrot.slane %v4806_v39, %v4590_v17  ;;  %v1013_v15 = vrot.slane %v4806_v39, %v4593_v18  ;;  %v2988_v31 = vcombine.low %v1468_v51, %v1475_v61  ;;  %v2995_v33 = vrot.slane %v2987_v13, %v4610_v32 }
  0xea   :  { %3847 = vperm.xlu0 %4486, %v3530_v62   ;;  %v3224_v26 = vcombine.low %v3216_v6, %v3223_v48  ;;  %v2681_v34 = vcombine.low %v950_v0, %v957_v9  ;;  %v4870_v24 = vcombine.low %v1874_v59, %v1881_v7  ;;  %v1020_v28 = vrot.slane %v4806_v39, %v4596_v19 }
  0xeb   :  { %v4861_v23 = vpop.xlane.xlu0 %573  ;;  %v1027_v35 = vrot.slane %v4806_v39, %v4599_v20  ;;  %v2682_v36 = vcombine.low %v964_v10, %v971_v1  ;;  %v4884_v37 = vcombine.low %v1888_v3, %v1895_v8  ;;  %v1482_v0 = vrot.slane %v4850_v12, %v4590_v17 }
  0xec   :  { %3793 = vperm.xlu1 %4487, %v3224_v26   ;;  %v3002_v9 = vrot.slane %v2988_v31, %v4610_v32  ;;  %v2689_v29 = vrot.slane %v2681_v34, %v4610_v32  ;;  %v1489_v25 = vrot.slane %v4850_v12, %v4593_v18  ;;  %v1496_v30 = vrot.slane %v4850_v12, %v4596_v19 }
  0xed   :  { %v4882_v27 = vpop.xlane.xlu1 %717  ;;  %v1503_v21 = vrot.slane %v4850_v12, %v4599_v20  ;;  %v2696_v10 = vrot.slane %v2682_v36, %v4610_v32  ;;  %v4899_v38 = vcombine.low %v1006_v22, %v1013_v15  ;;  %v3531_v42 = vcombine.low %v2350_v14, %v2357_v5 }
  0xee   :  { %v3003_v39 = vcombine.low %v2995_v33, %v3002_v9  ;;  %v3532_v45 = vcombine.low %v2364_v53, %v2371_v16  ;;  %v4901_v49 = vcombine.low %v1020_v28, %v1027_v35  ;;  %v3225_v52 = vcombine.low %v1846_v2, %v1853_v41 }
  0xef   :  { %v4897_v1 = vpop.xlane.xlu0 %669  ;;  %v2697_v50 = vcombine.low %v2689_v29, %v2696_v10  ;;  %v3226_v47 = vcombine.low %v1860_v55, %v1867_v56  ;;  %v1902_v54 = vrot.slane %v4830_v43, %v4590_v17  ;;  %v1909_v51 = vrot.slane %v4830_v43, %v4593_v18 }
  0xf0   :  { %3754 = vperm.xlu0 %4486, %v3003_v39   ;;  %v3539_v59 = vrot.slane %v3531_v42, %v4610_v32  ;;  %v3546_v60 = vrot.slane %v3532_v45, %v4610_v32  ;;  %v1916_v61 = vrot.slane %v4830_v43, %v4596_v19  ;;  %v1923_v40 = vrot.slane %v4830_v43, %v4599_v20 }
  0xf1   :  { %v625_v44 = vpop.xlane.xlu1 %624  ;;  %3700 = vperm.xlu1 %4487, %v2697_v50   ;;  %v3233_v2 = vrot.slane %v3225_v52, %v4610_v32  ;;  %v3240_v41 = vrot.slane %v3226_v47, %v4610_v32  ;;  %v2378_v56 = vrot.slane %v4882_v27, %v4590_v17  ;;  %v2385_v7 = vrot.slane %v4882_v27, %v4593_v18 }
  0xf2   :  { %v3547_v63 = vcombine.low %v3539_v59, %v3546_v60  ;;  %v1510_v4 = vrot.slane %v625_v44, %v4590_v17  ;;  %v1517_v6 = vrot.slane %v625_v44, %v4593_v18  ;;  %v2392_v43 = vrot.slane %v4882_v27, %v4596_v19 }
  0xf3   :  { %v4921_v55 = vpop.xlane.xlu0 %576  ;;  %v2399_v3 = vrot.slane %v4882_v27, %v4599_v20  ;;  %v3241_v8 = vcombine.low %v3233_v2, %v3240_v41  ;;  %v4933_v13 = vcombine.low %v1902_v54, %v1909_v51  ;;  %v3004_v14 = vcombine.low %v1482_v0, %v1489_v25 }
  0xf4   :  { %3850 = vperm.xlu0 %4486, %v3547_v63   ;;  %v3005_v5 = vcombine.low %v1496_v30, %v1503_v21  ;;  %v2706_v62 = vrot.slane %v4822_v57, %v4610_v32  ;;  %v4937_v48 = vcombine.low %v1916_v61, %v1923_v40  ;;  %v1524_v53 = vrot.slane %v625_v44, %v4596_v19 }
  0xf5   :  { %v721_v12 = vpop.xlane.xlu1 %720  ;;  %3796 = vperm.xlu1 %4487, %v3241_v8   ;;  %v1531_v16 = vrot.slane %v625_v44, %v4599_v20  ;;  %v2713_v22 = vrot.slane %v4824_v58, %v4610_v32  ;;  %v3021_v26 = vcombine.low %v1510_v4, %v1517_v6  ;;  %v1034_v31 = vrot.slane %v4861_v23, %v4590_v17 }
  0xf6   :  { %v3012_v33 = vrot.slane %v3004_v14, %v4610_v32  ;;  %v3019_v57 = vrot.slane %v3005_v5, %v4610_v32  ;;  %v1041_v34 = vrot.slane %v4861_v23, %v4593_v18  ;;  %v1048_v28 = vrot.slane %v4861_v23, %v4596_v19 }
  0xf7   :  { %v4943_v15 = vpop.xlane.xlu0 %672  ;;  %v1055_v35 = vrot.slane %v4861_v23, %v4599_v20  ;;  %v2714_v58 = vcombine.low %v2706_v62, %v2713_v22  ;;  %v2406_v0 = vrot.slane %v721_v12, %v4590_v17  ;;  %v2413_v9 = vrot.slane %v721_v12, %v4593_v18 }
  0xf8   :  { %v3020_v27 = vcombine.low %v3012_v33, %v3019_v57  ;;  %v2420_v29 = vrot.slane %v721_v12, %v4596_v19  ;;  %v2427_v25 = vrot.slane %v721_v12, %v4599_v20  ;;  %v3548_v30 = vcombine.low %v2378_v56, %v2385_v7 }
  0xf9   :  { %v628_v36 = vpop.xlane.xlu1 %627  ;;  %3703 = vperm.xlu1 %4487, %v2714_v58   ;;  %v3549_v21 = vcombine.low %v2392_v43, %v2399_v3  ;;  %v3250_v10 = vrot.slane %v4870_v24, %v4610_v32  ;;  %v3022_v23 = vcombine.low %v1524_v53, %v1531_v16  ;;  %v1930_v42 = vrot.slane %v4897_v1, %v4590_v17 }
  0xfa   :  { %3757 = vperm.xlu0 %4486, %v3020_v27   ;;  %v1937_v45 = vrot.slane %v4897_v1, %v4593_v18  ;;  %v3257_v50 = vrot.slane %v4884_v37, %v4610_v32  ;;  %v3556_v52 = vrot.slane %v3548_v30, %v4610_v32  ;;  %v1538_v44 = vrot.slane %v628_v36, %v4590_v17 }
  0xfb   :  { %v4961_v39 = vpop.xlane.xlu0 %579  ;;  %v3563_v47 = vrot.slane %v3549_v21, %v4610_v32  ;;  %v1545_v24 = vrot.slane %v628_v36, %v4593_v18  ;;  %v4975_v51 = vcombine.low %v1034_v31, %v1041_v34  ;;  %v4977_v59 = vcombine.low %v1048_v28, %v1055_v35 }
  0xfc   :  { %v3565_v60 = vcombine.low %v2406_v0, %v2413_v9  ;;  %v3258_v61 = vcombine.low %v3250_v10, %v3257_v50  ;;  %v3566_v40 = vcombine.low %v2420_v29, %v2427_v25  ;;  %v1552_v37 = vrot.slane %v628_v36, %v4596_v19 }
  0xfd   :  { %v4973_v54 = vpop.xlane.xlu1 %723  ;;  %v3564_v2 = vcombine.low %v3556_v52, %v3563_v47  ;;  %v1559_v41 = vrot.slane %v628_v36, %v4599_v20  ;;  %v1944_v63 = vrot.slane %v4897_v1, %v4596_v19  ;;  %v3029_v4 = vrot.slane %v3021_v26, %v4610_v32 }
  0xfe   :  { %3799 = vperm.xlu1 %4487, %v3258_v61   ;;  %v3036_v6 = vrot.slane %v3022_v23, %v4610_v32  ;;  %v2723_v7 = vrot.slane %v4899_v38, %v4610_v32  ;;  %v1951_v43 = vrot.slane %v4897_v1, %v4599_v20  ;;  %v4991_v3 = vcombine.low %v1930_v42, %v1937_v45 }
  0xff   :  { %v4981_v56 = vpop.xlane.xlu0 %675  ;;  %3853 = vperm.xlu0 %4486, %v3564_v2   ;;  %v3038_v8 = vcombine.low %v1538_v44, %v1545_v24  ;;  %v2730_v12 = vrot.slane %v4901_v49, %v4610_v32  ;;  %v1062_v5 = vrot.slane %v4921_v55, %v4590_v17  ;;  %v2434_v53 = vrot.slane %v4973_v54, %v4590_v17 }
 0x100   :  { %v3037_v62 = vcombine.low %v3029_v4, %v3036_v6  ;;  %v2441_v38 = vrot.slane %v4973_v54, %v4593_v18  ;;  %v3039_v16 = vcombine.low %v1552_v37, %v1559_v41  ;;  %v1069_v1 = vrot.slane %v4921_v55, %v4593_v18 }
 0x101   :  { %v631_v14 = vpop.xlane.xlu1 %630  ;;  %v1076_v22 = vrot.slane %v4921_v55, %v4596_v19  ;;  %v2731_v26 = vcombine.low %v2723_v7, %v2730_v12  ;;  %v1083_v31 = vrot.slane %v4921_v55, %v4599_v20  ;;  %v2448_v33 = vrot.slane %v4973_v54, %v4596_v19 }
 0x102   :  { %v3573_v57 = vrot.slane %v3565_v60, %v4610_v32  ;;  %v3580_v34 = vrot.slane %v3566_v40, %v4610_v32  ;;  %v2455_v28 = vrot.slane %v4973_v54, %v4599_v20  ;;  %v3267_v35 = vrot.slane %v4933_v13, %v4610_v32 }
 0x103   :  { %v5005_v49 = vpop.xlane.xlu0 %582  ;;  %3760 = vperm.xlu0 %4486, %v3037_v62   ;;  %3706 = vperm.xlu1 %4487, %v2731_v26   ;;  %v3274_v58 = vrot.slane %v4937_v48, %v4610_v32  ;;  %v5022_v55 = vadd.s32 4294967288, %v4833_v46  ;;  %v3582_v27 = vcombine.low %v2434_v53, %v2441_v38  ;;  %v1958_v0 = vrot.slane %v4943_v15, %v4590_v17 }
 0x104   :  { %v1965_v9 = vrot.slane %v4943_v15, %v4593_v18  ;;  %v3581_v29 = vcombine.low %v3573_v57, %v3580_v34  ;;  %v1972_v25 = vrot.slane %v4943_v15, %v4596_v19  ;;  %v1979_v13 = vrot.slane %v4943_v15, %v4599_v20 }
 0x105   :  { %v5019_v36 = vpop.xlane.xlu1 %726  ;;  %v3275_v48 = vcombine.low %v3267_v35, %v3274_v58  ;;  %v1566_v30 = vrot.slane %v631_v14, %v4590_v17  ;;  %v1573_v10 = vrot.slane %v631_v14, %v4593_v18  ;;  %v1580_v23 = vrot.slane %v631_v14, %v4596_v19 }
 0x106   :  { %v1587_v42 = vrot.slane %v631_v14, %v4599_v20  ;;  %v1090_v45 = vrot.slane %v4961_v39, %v4590_v17  ;;  %v1097_v50 = vrot.slane %v4961_v39, %v4593_v18  ;;  %v3046_v15 = vrot.slane %v3038_v8, %v4610_v32 }
 0x107   :  { %v5033_v21 = vpop.xlane.xlu0 %678  ;;  %3856 = vperm.xlu0 %4486, %v3581_v29   ;;  %3802 = vperm.xlu1 %4487, %v3275_v48   ;;  %v3053_v52 = vrot.slane %v3039_v16, %v4610_v32  ;;  %v5045_v44 = vadd.s32 4294967280, %v4833_v46  ;;  %v3277_v24 = vcombine.low %v1944_v63, %v1951_v43  ;;  %v3583_v54 = vcombine.low %v2448_v33, %v2455_v28 }
 0x108   :  { %v2740_v60 = vrot.slane %v4975_v51, %v4610_v32  ;;  %v2747_v61 = vrot.slane %v4977_v59, %v4610_v32  ;;  %v2749_v40 = vcombine.low %v1062_v5, %v1069_v1  ;;  %v1104_v2 = vrot.slane %v4961_v39, %v4596_v19 }
 0x109   :  { %v634_v47 = vpop.xlane.xlu1 %633  ;;  %v1111_v37 = vrot.slane %v4961_v39, %v4599_v20  ;;  %v3054_v41 = vcombine.low %v3046_v15, %v3053_v52  ;;  %v2750_v6 = vcombine.low %v1076_v22, %v1083_v31  ;;  %v5057_v7 = vcombine.low %v1958_v0, %v1965_v9 }
 0x10a   :  { %v5059_v63 = vcombine.low %v1972_v25, %v1979_v13  ;;  %v2748_v43 = vcombine.low %v2740_v60, %v2747_v61  ;;  %v3055_v51 = vcombine.low %v1566_v30, %v1573_v10  ;;  %v3056_v8 = vcombine.low %v1580_v23, %v1587_v42 }
 0x10b   :  { %v5055_v4 = vpop.xlane.xlu0 %585  ;;  %v5061_v12 = vcombine.low %v1090_v45, %v1097_v50  ;;  %3763 = vperm.xlu0 %4486, %v3054_v41   ;;  %v3590_v59 = vrot.slane %v3582_v27, %v4610_v32  ;;  %v2462_v39 = vrot.slane %v5019_v36, %v4590_v17  ;;  %v2469_v5 = vrot.slane %v5019_v36, %v4593_v18 }
 0x10c   :  { %3709 = vperm.xlu1 %4487, %v2748_v43   ;;  %v3597_v62 = vrot.slane %v3583_v54, %v4610_v32  ;;  %v3284_v53 = vrot.slane %v4991_v3, %v4610_v32  ;;  %v5073_v38 = vcombine.low %v1104_v2, %v1111_v37  ;;  %v2476_v16 = vrot.slane %v5019_v36, %v4596_v19 }
 0x10d   :  { %v5064_v14 = vpop.xlane.xlu1 %729  ;;  %v2483_v1 = vrot.slane %v5019_v36, %v4599_v20  ;;  %v3291_v22 = vrot.slane %v3277_v24, %v4610_v32  ;;  %v1986_v31 = vrot.slane %v4981_v56, %v4590_v17  ;;  %v1993_v33 = vrot.slane %v4981_v56, %v4593_v18 }
 0x10e   :  { %v3598_v57 = vcombine.low %v3590_v59, %v3597_v62  ;;  %v1594_v3 = vrot.slane %v634_v47, %v4590_v17  ;;  %v1601_v28 = vrot.slane %v634_v47, %v4593_v18  ;;  %v1608_v35 = vrot.slane %v634_v47, %v4596_v19 }
 0x10f   :  { %v5080_v26 = vpop.xlane.xlu0 %681  ;;  %v3292_v34 = vcombine.low %v3284_v53, %v3291_v22  ;;  %v1615_v58 = vrot.slane %v634_v47, %v4599_v20  ;;  %v3599_v27 = vcombine.low %v2462_v39, %v2469_v5  ;;  %v2000_v0 = vrot.slane %v4981_v56, %v4596_v19 }
 0x110   :  { %3859 = vperm.xlu0 %4486, %v3598_v57   ;;  %v3063_v9 = vrot.slane %v3055_v51, %v4610_v32  ;;  %v3070_v29 = vrot.slane %v3056_v8, %v4610_v32  ;;  %v3600_v25 = vcombine.low %v2476_v16, %v2483_v1  ;;  %v2007_v13 = vrot.slane %v4981_v56, %v4599_v20 }
 0x111   :  { %v5090_v36 = vpop.xlane.xlu1 %636  ;;  %3805 = vperm.xlu1 %4487, %v3292_v34   ;;  %v2757_v48 = vrot.slane %v2749_v40, %v4610_v32  ;;  %v2764_v30 = vrot.slane %v2750_v6, %v4610_v32  ;;  %v5100_v10 = vcombine.low %v1986_v31, %v1993_v33  ;;  %v1118_v23 = vrot.slane %v5005_v49, %v4590_v17 }
 0x112   :  { %v1125_v42 = vrot.slane %v5005_v49, %v4593_v18  ;;  %v3071_v45 = vcombine.low %v3063_v9, %v3070_v29  ;;  %v3072_v15 = vcombine.low %v1594_v3, %v1601_v28  ;;  %v3073_v52 = vcombine.low %v1608_v35, %v1615_v58 }
 0x113   :  { %v5106_v50 = vpop.xlane.xlu0 %588  ;;  %v1132_v56 = vrot.slane %v5005_v49, %v4596_v19  ;;  %v2765_v47 = vcombine.low %v2757_v48, %v2764_v30  ;;  %v1139_v54 = vrot.slane %v5005_v49, %v4599_v20  ;;  %v2490_v60 = vrot.slane %v5064_v14, %v4590_v17 }
 0x114   :  { %3766 = vperm.xlu0 %4486, %v3071_v45   ;;  %v2497_v61 = vrot.slane %v5064_v14, %v4593_v18  ;;  %v3607_v40 = vrot.slane %v3599_v27, %v4610_v32  ;;  %v2504_v2 = vrot.slane %v5064_v14, %v4596_v19  ;;  %v2511_v37 = vrot.slane %v5064_v14, %v4599_v20 }
 0x115   :  { %v5110_v24 = vpop.xlane.xlu1 %732  ;;  %3712 = vperm.xlu1 %4487, %v2765_v47   ;;  %v3614_v41 = vrot.slane %v3600_v25, %v4610_v32  ;;  %v3301_v49 = vrot.slane %v5057_v7, %v4610_v32  ;;  %v3311_v6 = vcombine.low %v2000_v0, %v2007_v13  ;;  %v5126_v43 = vcombine.low %v1118_v23, %v1125_v42 }
 0x116   :  { %v2014_v51 = vrot.slane %v5033_v21, %v4590_v17  ;;  %v3308_v8 = vrot.slane %v5059_v63, %v4610_v32  ;;  %v2021_v59 = vrot.slane %v5033_v21, %v4593_v18  ;;  %v2028_v14 = vrot.slane %v5033_v21, %v4596_v19 }
 0x117   :  { %v2035_v39 = vrot.slane %v5033_v21, %v4599_v20  ;;  %v3615_v5 = vcombine.low %v3607_v40, %v3614_v41  ;;  %v5138_v7 = vcombine.low %v1132_v56, %v1139_v54  ;;  %v1622_v53 = vrot.slane %v5090_v36, %v4590_v17  ;;  %v5146_v1 = vpop.xlane.xlu0 %684 }
 0x118   :  { %v3309_v62 = vcombine.low %v3301_v49, %v3308_v8  ;;  %v1629_v16 = vrot.slane %v5090_v36, %v4593_v18  ;;  %v3616_v22 = vcombine.low %v2490_v60, %v2497_v61  ;;  %v3617_v31 = vcombine.low %v2504_v2, %v2511_v37 }
 0x119   :  { %v5144_v63 = vpop.xlane.xlu1 %639  ;;  %3862 = vperm.xlu0 %4486, %v3615_v5   ;;  %v3080_v33 = vrot.slane %v3072_v15, %v4610_v32  ;;  %v3087_v21 = vrot.slane %v3073_v52, %v4610_v32  ;;  %v1636_v57 = vrot.slane %v5090_v36, %v4596_v19  ;;  %v1643_v3 = vrot.slane %v5090_v36, %v4599_v20 }
 0x11a   :  { %3808 = vperm.xlu1 %4487, %v3309_v62   ;;  %v2774_v34 = vrot.slane %v5061_v12, %v4610_v32  ;;  %v2781_v28 = vrot.slane %v5073_v38, %v4610_v32  ;;  %v5158_v35 = vcombine.low %v2014_v51, %v2021_v59  ;;  %v5160_v58 = vcombine.low %v2028_v14, %v2035_v39 }
 0x11b   :  { %v1146_v27 = vrot.slane %v5055_v4, %v4590_v17  ;;  %v3088_v0 = vcombine.low %v3080_v33, %v3087_v21  ;;  %v3089_v9 = vcombine.low %v1622_v53, %v1629_v16  ;;  %v2518_v25 = vrot.slane %v5110_v24, %v4590_v17  ;;  %v5182_v52 = vpop.xlane.xlu0 %591 }
 0x11c   :  { %v2782_v29 = vcombine.low %v2774_v34, %v2781_v28  ;;  %v2525_v36 = vrot.slane %v5110_v24, %v4593_v18  ;;  %v1153_v12 = vrot.slane %v5055_v4, %v4593_v18  ;;  %v2532_v38 = vrot.slane %v5110_v24, %v4596_v19 }
 0x11d   :  { %3769 = vperm.xlu0 %4486, %v3088_v0   ;;  %v2539_v13 = vrot.slane %v5110_v24, %v4599_v20  ;;  %v3624_v48 = vrot.slane %v3616_v22, %v4610_v32  ;;  %v3090_v30 = vcombine.low %v1636_v57, %v1643_v3  ;;  %v1160_v23 = vrot.slane %v5055_v4, %v4596_v19  ;;  %v5180_v15 = vpop.xlane.xlu1 %735 }
 0x11e   :  { %3715 = vperm.xlu1 %4487, %v2782_v29   ;;  %v3631_v42 = vrot.slane %v3617_v31, %v4610_v32  ;;  %v3318_v45 = vrot.slane %v5100_v10, %v4610_v32  ;;  %v1167_v56 = vrot.slane %v5055_v4, %v4599_v20  ;;  %v2042_v47 = vrot.slane %v5080_v26, %v4590_v17 }
 0x11f   :  { %v2049_v24 = vrot.slane %v5080_v26, %v4593_v18  ;;  %v3325_v54 = vrot.slane %v3311_v6, %v4610_v32  ;;  %v3633_v60 = vcombine.low %v2518_v25, %v2525_v36  ;;  %v2056_v61 = vrot.slane %v5080_v26, %v4596_v19  ;;  %v5217_v22 = vpop.xlane.xlu0 %687 }
 0x120   :  { %v2063_v10 = vrot.slane %v5080_v26, %v4599_v20  ;;  %v3632_v40 = vcombine.low %v3624_v48, %v3631_v42  ;;  %v3634_v2 = vcombine.low %v2532_v38, %v2539_v13  ;;  %v1650_v4 = vrot.slane %v5144_v63, %v4590_v17 }
 0x121   :  { %v3326_v37 = vcombine.low %v3318_v45, %v3325_v54  ;;  %v1657_v41 = vrot.slane %v5144_v63, %v4593_v18  ;;  %v1664_v49 = vrot.slane %v5144_v63, %v4596_v19  ;;  %v1671_v6 = vrot.slane %v5144_v63, %v4599_v20  ;;  %v643_v63 = vpop.xlane.xlu1 %642 }
 0x122   :  { %3865 = vperm.xlu0 %4486, %v3632_v40   ;;  %v3097_v51 = vrot.slane %v3089_v9, %v4610_v32  ;;  %v3104_v26 = vrot.slane %v3090_v30, %v4610_v32  ;;  %v1174_v8 = vrot.slane %v5106_v50, %v4590_v17  ;;  %v1181_v59 = vrot.slane %v5106_v50, %v4593_v18 }
 0x123   :  { %3811 = vperm.xlu1 %4487, %v3326_v37   ;;  %v2791_v14 = vrot.slane %v5126_v43, %v4610_v32  ;;  %v2798_v39 = vrot.slane %v5138_v7, %v4610_v32  ;;  %v2800_v5 = vcombine.low %v1146_v27, %v1153_v12  ;;  %v1188_v62 = vrot.slane %v5106_v50, %v4596_v19 }
 0x124   :  { %v1195_v53 = vrot.slane %v5106_v50, %v4599_v20  ;;  %v3105_v16 = vcombine.low %v3097_v51, %v3104_v26  ;;  %v2801_v31 = vcombine.low %v1160_v23, %v1167_v56  ;;  %v2546_v21 = vrot.slane %v5180_v15, %v4590_v17 }
 0x125   :  { %v2799_v33 = vcombine.low %v2791_v14, %v2798_v39  ;;  %v2553_v43 = vrot.slane %v5180_v15, %v4593_v18  ;;  %v5223_v7 = vcombine.low %v2042_v47, %v2049_v24  ;;  %v5225_v57 = vcombine.low %v2056_v61, %v2063_v10  ;;  %v739_v45 = vpop.xlane.xlu1 %738 }
 0x126   :  { %v3106_v3 = vcombine.low %v1650_v4, %v1657_v41  ;;  %3772 = vperm.xlu0 %4486, %v3105_v16   ;;  %v3641_v50 = vrot.slane %v3633_v60, %v4610_v32  ;;  %v3107_v34 = vcombine.low %v1664_v49, %v1671_v6  ;;  %v5228_v28 = vcombine.low %v1174_v8, %v1181_v59 }
 0x127   :  { %3718 = vperm.xlu1 %4487, %v2799_v33   ;;  %v3648_v27 = vrot.slane %v3634_v2, %v4610_v32  ;;  %v3335_v0 = vrot.slane %v5158_v35, %v4610_v32  ;;  %v5233_v9 = vcombine.low %v1188_v62, %v1195_v53  ;;  %v2560_v29 = vrot.slane %v5180_v15, %v4596_v19 }
 0x128   :  { %v2567_v25 = vrot.slane %v5180_v15, %v4599_v20  ;;  %v3342_v36 = vrot.slane %v5160_v58, %v4610_v32  ;;  %v3650_v12 = vcombine.low %v2546_v21, %v2553_v43  ;;  %v2070_v38 = vrot.slane %v5146_v1, %v4590_v17  ;;  %v5249_v15 = vpop.xlane.xlu0 %594 }
 0x129   :  { %v2077_v13 = vrot.slane %v5146_v1, %v4593_v18  ;;  %v3649_v48 = vcombine.low %v3641_v50, %v3648_v27  ;;  %v2084_v35 = vrot.slane %v5146_v1, %v4596_v19  ;;  %v1678_v23 = vrot.slane %v643_v63, %v4590_v17 }
 0x12a   :  { %v3343_v30 = vcombine.low %v3335_v0, %v3342_v36  ;;  %v1685_v42 = vrot.slane %v643_v63, %v4593_v18  ;;  %v1692_v58 = vrot.slane %v643_v63, %v4596_v19  ;;  %v1699_v56 = vrot.slane %v643_v63, %v4599_v20 }
 0x12b   :  { %3868 = vperm.xlu0 %4486, %v3649_v48   ;;  %v3114_v47 = vrot.slane %v3106_v3, %v4610_v32  ;;  %v3121_v24 = vrot.slane %v3107_v34, %v4610_v32  ;;  %v3651_v54 = vcombine.low %v2560_v29, %v2567_v25  ;;  %v2091_v60 = vrot.slane %v5146_v1, %v4599_v20 }
 0x12c   :  { %3814 = vperm.xlu1 %4487, %v3343_v30   ;;  %v2808_v61 = vrot.slane %v2800_v5, %v4610_v32  ;;  %v2815_v10 = vrot.slane %v2801_v31, %v4610_v32  ;;  %v3361_v40 = vcombine.low %v2070_v38, %v2077_v13  ;;  %v2574_v37 = vrot.slane %v739_v45, %v4590_v17  ;;  %v5275_v53 = vpop.xlane.xlu0 %690 }
 0x12d   :  { %v3122_v2 = vcombine.low %v3114_v47, %v3121_v24  ;;  %v2581_v4 = vrot.slane %v739_v45, %v4593_v18  ;;  %v3123_v41 = vcombine.low %v1678_v23, %v1685_v42  ;;  %v2588_v6 = vrot.slane %v739_v45, %v4596_v19 }
 0x12e   :  { %v2816_v49 = vcombine.low %v2808_v61, %v2815_v10  ;;  %v2595_v51 = vrot.slane %v739_v45, %v4599_v20  ;;  %v3124_v26 = vcombine.low %v1692_v58, %v1699_v56  ;;  %v1202_v1 = vrot.slane %v5182_v52, %v4590_v17 }
 0x12f   :  { %v1209_v8 = vrot.slane %v5182_v52, %v4593_v18  ;;  %3775 = vperm.xlu0 %4486, %v3122_v2   ;;  %v3658_v59 = vrot.slane %v3650_v12, %v4610_v32  ;;  %v1216_v14 = vrot.slane %v5182_v52, %v4596_v19  ;;  %v1223_v39 = vrot.slane %v5182_v52, %v4599_v20 }
 0x130   :  { %3721 = vperm.xlu1 %4487, %v2816_v49   ;;  %v3665_v5 = vrot.slane %v3651_v54, %v4610_v32  ;;  %v3352_v62 = vrot.slane %v5223_v7, %v4610_v32  ;;  %v3667_v16 = vcombine.low %v2574_v37, %v2581_v4  ;;  %v2098_v63 = vrot.slane %v5217_v22, %v4590_v17 }
 0x131   :  { %v2105_v31 = vrot.slane %v5217_v22, %v4593_v18  ;;  %v3359_v33 = vrot.slane %v5225_v57, %v4610_v32  ;;  %v3362_v52 = vcombine.low %v2084_v35, %v2091_v60  ;;  %v3668_v21 = vcombine.low %v2588_v6, %v2595_v51 }
 0x132   :  { %v3666_v43 = vcombine.low %v3658_v59, %v3665_v5  ;;  %v3131_v3 = vrot.slane %v3123_v41, %v4610_v32  ;;  %v2834_v50 = vcombine.low %v1202_v1, %v1209_v8  ;;  %v3138_v34 = vrot.slane %v3124_v26, %v4610_v32 }
 0x133   :  { %v3360_v7 = vcombine.low %v3352_v62, %v3359_v33  ;;  %v2825_v27 = vrot.slane %v5228_v28, %v4610_v32  ;;  %v2835_v0 = vcombine.low %v1216_v14, %v1223_v39  ;;  %v2112_v29 = vrot.slane %v5217_v22, %v4596_v19  ;;  %v3686_v23 = vpop.permute.xlu0 %3685 }
 0x134   :  { %v2119_v57 = vrot.slane %v5217_v22, %v4599_v20  ;;  %3871 = vperm.xlu0 %4486, %v3666_v43   ;;  %v2832_v25 = vrot.slane %v5233_v9, %v4610_v32  ;;  %v3378_v12 = vcombine.low %v2098_v63, %v2105_v31  ;;  %v1230_v38 = vrot.slane %v5249_v15, %v4590_v17 }
 0x135   :  { %3817 = vperm.xlu1 %4487, %v3360_v7   ;;  %v3139_v13 = vcombine.low %v3131_v3, %v3138_v34  ;;  %v3675_v28 = vrot.slane %v3667_v16, %v4610_v32  ;;  %v1237_v48 = vrot.slane %v5249_v15, %v4593_v18  ;;  %v3682_v30 = vrot.slane %v3668_v21, %v4610_v32 }
 0x136   :  { %v3689_v36 = vpop.permute.xlu1 %3688  ;;  %v2833_v35 = vcombine.low %v2825_v27, %v2832_v25  ;;  %v3369_v22 = vrot.slane %v3361_v40, %v4610_v32  ;;  %v1244_v9 = vrot.slane %v5249_v15, %v4596_v19  ;;  %v1251_v42 = vrot.slane %v5249_v15, %v4599_v20 }
 0x137   :  { %v3376_v45 = vrot.slane %v3362_v52, %v4610_v32  ;;  %v5307_v58 = vsub.s32 %v4833_v46, %v4587_v11  ;;  %v3379_v56 = vcombine.low %v2112_v29, %v2119_v57  ;;  %v3683_v47 = vcombine.low %v3675_v28, %v3682_v30 }
 0x138   :  { %3778 = vperm.xlu0 %4486, %v3139_v13   ;;  %v2842_v24 = vrot.slane %v2834_v50, %v4610_v32  ;;  %v5312_v54 = vsub.s32 %v5022_v55, %v4587_v11  ;;  %v2849_v10 = vrot.slane %v2835_v0, %v4610_v32  ;;  %v2851_v37 = vcombine.low %v1230_v38, %v1237_v48 }
 0x139   :  { %3724 = vperm.xlu1 %4487, %v2833_v35   ;;  %v3377_v61 = vcombine.low %v3369_v22, %v3376_v45  ;;  %v3881_v15 = vrot.slane %v3686_v23, %v5307_v58  ;;  %v2852_v4 = vcombine.low %v1244_v9, %v1251_v42  ;;  %v2126_v41 = vrot.slane %v5275_v53, %v4590_v17 }
 0x13a   :  { %v3734_v60 = vpop.permute.xlu1 %3733  ;;  %v3886_v2 = vrot.slane %v3689_v36, %v5312_v54  ;;  %v2133_v55 = vrot.slane %v5275_v53, %v4593_v18  ;;  %v2140_v49 = vrot.slane %v5275_v53, %v4596_v19  ;;  %v2147_v6 = vrot.slane %v5275_v53, %v4599_v20 }
 0x13b   :  { %v3990_v40 = vrot.slane %v3734_v60, %v5307_v58  ;;  %v3386_v26 = vrot.slane %v3378_v12, %v4610_v32  ;;  %v2850_v8 = vcombine.low %v2842_v24, %v2849_v10  ;;  %v3393_v59 = vrot.slane %v3379_v56, %v4610_v32 }
 0x13c   :  { %3874 = vperm.xlu0 %4486, %v3683_v47   ;;  %v3888_v51 = vsel %vm3887_vm0, %v3886_v2, %v3881_v15  ;;  %v5332_v18 = vsub.s32 %v5045_v44, %v4587_v11  ;;  %v3395_v20 = vcombine.low %v2126_v41, %v2133_v55  ;;  %v3396_v14 = vcombine.low %v2140_v49, %v2147_v6  ;;  %v4248_v41 = vld [vmem:[%s5578_s2] sm:$0xff]  ;;  %v4249_v6 = vld [vmem:[%s5578_s2 + $0x8] sm:$0xff] }
 0x13d   :  { %3820 = vperm.xlu1 %4487, %v3377_v61   ;;  %v2859_v39 = vrot.slane %v2851_v37, %v4610_v32  ;;  %v3896_v53 = vadd.s32 4294967272, %v4833_v46  ;;  %v3394_v16 = vcombine.low %v3386_v26, %v3393_v59  ;;  %v2866_v63 = vrot.slane %v2852_v4, %v4610_v32  ;;  %v4264_v37 = vld [vmem:[%s5578_s2 + $0x80] sm:$0xff]  ;;  %v4265_v4 = vld [vmem:[%s5578_s2 + $0x88] sm:$0xff]  ;;  %v4267_v26 = vld [vmem:[%s5578_s2 + $0x98] sm:$0xff] }
 0x13e   :  { %v3737_v1 = vpop.permute.xlu1 %3736  ;;  %v3403_v52 = vrot.slane %v3395_v20, %v4610_v32  ;;  %v3410_v21 = vrot.slane %v3396_v14, %v4610_v32  ;;  %v3903_v38 = vadd.s32 4294967264, %v4833_v46  ;;  %v4549_v35 = vmov 0.0   ;;  %v4268_v20 = vld [vmem:[%s5578_s2 + $0xa0] sm:$0xff] }
 0x13f   :  { %v3994_v17 = vrot.slane %v3737_v1, %v5312_v54  ;;  %v2867_v50 = vcombine.low %v2859_v39, %v2866_v63  ;;  %v5346_v27 = vsub.s32 %v3896_v53, %v4587_v11  ;;  %34 = vst [vmem:[#allocation2] sm:$0xf] %v4549_v35  ;;  %v3910_v61 = vadd.s32 4294967256, %v4833_v46  ;;  %v4252_v63 = vld [vmem:[%s5578_s2 + $0x20] sm:$0xff] }
 0x140   :  { %v3411_v25 = vcombine.low %v3403_v52, %v3410_v21  ;;  %v5356_v23 = vsub.s32 %v3903_v38, %v4587_v11  ;;  %v4441_v49 = vpack.c.bf16 %v4265_v4, %v4264_v37  ;;  %v3917_v52 = vadd.s32 4294967248, %v4833_v46  ;;  %v4270_v21 = vld [vmem:[%s5578_s2 + $0xb0] sm:$0xff]  ;;  %v4276_v4 = vld [vmem:[%s5578_s2 + $0xe0] sm:$0xff] }
 0x141   :  { %v3995_v19 = vsel %vm3887_vm0, %v3994_v17, %v3990_v40  ;;  %3727 = vperm.xlu1 %4487, %v2850_v8   ;;  %v5369_v2 = vsub.s32 %v3910_v61, %v4587_v11  ;;  %v4443_v8 = vpack.c.bf16 %v4249_v6, %v4248_v41  ;;  %v4250_v17 = vld [vmem:[%s5578_s2 + $0x10] sm:$0xff]  ;;  %v3924_v61 = vadd.s32 4294967240, %v4833_v46  ;;  %v4277_v41 = vld [vmem:[%s5578_s2 + $0xe8] sm:$0xff] }
 0x142   :  { %v3782_v5 = vpop.permute.xlu1 %3781  ;;  %v3740_v62 = vpop.permute.xlu0 %3739  ;;  %4442 = vmatprep.subr.bf16.mxu0 %v4441_v49  ;;  %v5430_v38 = vsub.s32 %v3917_v52, %v4587_v11 }
 0x143   :  { %v4069_v31 = vrot.slane %v3782_v5, %v5307_v58  ;;  %v3999_v44 = vrot.slane %v3740_v62, %v5332_v18  ;;  %4444 = vmatpush3.bf16.msra.mxu0 %v4443_v8  ;;  %v4465_v8 = vpack.c.bf16 %v4277_v41, %v4276_v4 }
 0x145   :  { %v4000_v33 = vsel %vm3894_vm1, %v3999_v44, %v3995_v19  ;;  %3823 = vperm.xlu1 %4487, %v3394_v16   ;;  %v4251_v19 = vld [vmem:[%s5578_s2 + $0x18] sm:$0xff] }
 0x146   :  { %v3785_v43 = vpop.permute.xlu1 %3784  ;;  %v3836_v3 = vpop.permute.xlu0 %3835  ;;  %v4447_v62 = vpack.c.bf16 %v4251_v19, %v4250_v17  ;;  %v4261_v17 = vld [vmem:[%s5578_s2 + $0x68] sm:$0xff]  ;;  %v4278_v19 = vld [vmem:[%s5578_s2 + $0xf0] sm:$0xff] }
 0x147   :  { %v4073_v7 = vrot.slane %v3785_v43, %v5312_v54  ;;  %v4157_v34 = vrot.slane %v3836_v3, %v5332_v18  ;;  %v4271_v43 = vld [vmem:[%s5578_s2 + $0xb8] sm:$0xff] }
 0x149   :  { %v4074_v0 = vsel %vm3887_vm0, %v4073_v7, %v4069_v31  ;;  %3730 = vperm.xlu1 %4487, %v2867_v50   ;;  %v4253_v31 = vld [vmem:[%s5578_s2 + $0x28] sm:$0xff] }
 0x14a   :  { %v3830_v29 = vpop.permute.xlu1 %3829  ;;  %v3743_v57 = vpop.permute.xlu0 %3742 }
 0x14b   :  { %v4148_v36 = vrot.slane %v3830_v29, %v5307_v58  ;;  %v4004_v12 = vrot.slane %v3743_v57, %v5346_v27  ;;  %v4453_v29 = vpack.c.bf16 %v4271_v43, %v4270_v21  ;;  %v4254_v57 = vld [vmem:[%s5578_s2 + $0x30] sm:$0xff] }
 0x14d   :  { %v4005_v13 = vsel %vm3901_vm2, %v4004_v12, %v4000_v33  ;;  %3826 = vperm.xlu1 %4487, %v3411_v25   ;;  %v4255_v25 = vld [vmem:[%s5578_s2 + $0x38] sm:$0xff] }
 0x14e   :  { %v3833_v28 = vpop.permute.xlu1 %3832  ;;  %v3839_v48 = vpop.permute.xlu0 %3838  ;;  %v4455_v35 = vpack.c.bf16 %v4255_v25, %v4254_v57 }
 0x14f   :  { %v4152_v30 = vrot.slane %v3833_v28, %v5312_v54  ;;  %v4162_v22 = vrot.slane %v3839_v48, %v5346_v27  ;;  %v4273_v28 = vld [vmem:[%s5578_s2 + $0xc8] sm:$0xff] }
 0x151   :  { %v4153_v9 = vsel %vm3887_vm0, %v4152_v30, %v4148_v36  ;;  %vm4386_vm0 = vcmask 73728  }
 0x152   :  { %v4158_v42 = vsel %vm3894_vm1, %v4157_v34, %v4153_v9  ;;  %v3692_v45 = vpop.permute.xlu1 %3691  ;;  %v3746_v58 = vpop.permute.xlu0 %3745  ;;  %v4451_v34 = vpack.c.bf16 %v4253_v31, %v4252_v63  ;;  %v4256_v9 = vld [vmem:[%s5578_s2 + $0x40] sm:$0xff] }
 0x153   :  { %v4163_v56 = vsel %vm3901_vm2, %v4162_v22, %v4158_v42  ;;  %v3893_v47 = vrot.slane %v3692_v45, %v5332_v18  ;;  %v4009_v24 = vrot.slane %v3746_v58, %v5356_v23  ;;  %v4257_v42 = vld [vmem:[%s5578_s2 + $0x48] sm:$0xff] }
 0x155   :  { %v3895_v54 = vsel %vm3894_vm1, %v3893_v47, %v3888_v51  ;;  %v4010_v60 = vsel %vm3908_vm3, %v4009_v24, %v4005_v13  ;;  %v4266_v51 = vld [vmem:[%s5578_s2 + $0x90] sm:$0xff]  ;;  %v4272_v13 = vld [vmem:[%s5578_s2 + $0xc0] sm:$0xff]  ;;  %v4275_v47 = vld [vmem:[%s5578_s2 + $0xd8] sm:$0xff] }
 0x156   :  { %v3842_v15 = vpop.permute.xlu0 %3841  ;;  %v4445_v59 = vpack.c.bf16 %v4267_v26, %v4266_v51  ;;  %v4457_v22 = vpack.c.bf16 %v4273_v28, %v4272_v13  ;;  %v3938_v13 = vadd.s32 4294967224, %v4833_v46 }
 0x157   :  { %v4167_v10 = vrot.slane %v3842_v15, %v5356_v23  ;;  %v3788_v55 = vpop.permute.xlu1 %3787 }
 0x158   :  { %v4078_v1 = vrot.slane %v3788_v55, %v5332_v18  ;;  %v4269_v18 = vld [vmem:[%s5578_s2 + $0xa8] sm:$0xff]  ;;  %4446 = vmatprep.subr.bf16.mxu0 %v4445_v59  ;;  %v4260_v59 = vld [vmem:[%s5578_s2 + $0x60] sm:$0xff] }
 0x159   :  { %v4168_v40 = vsel %vm3908_vm3, %v4167_v10, %v4163_v56  ;;  %v4449_v16 = vpack.c.bf16 %v4269_v18, %v4268_v20  ;;  %4448 = vmatpush3.bf16.msra.mxu0 %v4447_v62  ;;  %v4274_v56 = vld [vmem:[%s5578_s2 + $0xd0] sm:$0xff]  ;;  %v4467_v18 = vpack.c.bf16 %v4261_v17, %v4260_v59 }
 0x15a   :  { %v3749_v14 = vpop.permute.xlu0 %3748  ;;  %v4079_v39 = vsel %vm3894_vm1, %v4078_v1, %v4074_v0  ;;  %v4461_v15 = vpack.c.bf16 %v4275_v47, %v4274_v56  ;;  %v4258_v10 = vld [vmem:[%s5578_s2 + $0x50] sm:$0xff]  ;;  %v5472_v1 = vsub.s32 %v3924_v61, %v4587_v11  ;;  %v3945_v47 = vadd.s32 4294967216, %v4833_v46 }
 0x15b   :  { %v4014_v5 = vrot.slane %v3749_v14, %v5369_v2  ;;  %4450 = vmatprep.subr.bf16.mxu0 %v4449_v16  ;;  %v4263_v16 = vld [vmem:[%s5578_s2 + $0x78] sm:$0xff] }
 0x15c   :  { %v3695_v53 = vpop.permute.xlu1 %3694 }
 0x15d   :  { %v3900_v44 = vrot.slane %v3695_v53, %v5346_v27  ;;  %v4015_v33 = vsel %vm3915_vm4, %v4014_v5, %v4010_v60  ;;  %4452 = vmatpush3.bf16.msra.mxu0 %v4451_v34  ;;  %v4459_v60 = vpack.c.bf16 %v4257_v42, %v4256_v9  ;;  %v4262_v53 = vld [vmem:[%s5578_s2 + $0x70] sm:$0xff] }
 0x15e   :  { %v3845_v3 = vpop.permute.xlu0 %3844  ;;  %4454 = vmatprep.subr.bf16.mxu0 %v4453_v29  ;;  %v4471_v21 = vpack.c.bf16 %v4263_v16, %v4262_v53 }
 0x15f   :  { %v3902_v50 = vsel %vm3901_vm2, %v3900_v44, %v3895_v54  ;;  %v4172_v7 = vrot.slane %v3845_v3, %v5369_v2  ;;  %v3931_v44 = vadd.s32 4294967232, %v4833_v46 }
 0x160   :  { %v3791_v0 = vpop.permute.xlu1 %3790 }
 0x161   :  { %v4083_v36 = vrot.slane %v3791_v0, %v5346_v27  ;;  %v4173_v12 = vsel %vm3915_vm4, %v4172_v7, %v4168_v40  ;;  %4456 = vmatpush3.bf16.msra.mxu0 %v4455_v35  ;;  %v4259_v40 = vld [vmem:[%s5578_s2 + $0x58] sm:$0xff]  ;;  %v3934_v34 = vsub.s32 %v3931_v44, %v4587_v11 }
 0x162   :  { %4458 = vmatprep.subr.bf16.mxu0 %v4457_v22  ;;  %v4463_v6 = vpack.c.bf16 %v4259_v40, %v4258_v10  ;;  %v3948_v10 = vsub.s32 %v3945_v47, %v4587_v11 }
 0x163   :  { %v4084_v48 = vsel %vm3901_vm2, %v4083_v36, %v4079_v39  ;;  %v3752_v27 = vpop.permute.xlu0 %3751 }
 0x164   :  { %v3698_v30 = vpop.permute.xlu1 %3697  ;;  %v4019_v58 = vrot.slane %v3752_v27, %v5430_v38  ;;  %v3941_v27 = vsub.s32 %v3938_v13, %v4587_v11 }
 0x165   :  { %v3907_v45 = vrot.slane %v3698_v30, %v5356_v23  ;;  %4460 = vmatpush3.bf16.msra.mxu0 %v4459_v60 }
 0x166   :  { %v4020_v54 = vsel %vm3922_vm5, %v4019_v58, %v4015_v33  ;;  %4462 = vmatprep.subr.bf16.mxu0 %v4461_v15 }
 0x167   :  { %v3909_v24 = vsel %vm3908_vm3, %v3907_v45, %v3902_v50 }
 0x169   :  { %v3848_v37 = vpop.permute.xlu0 %3847  ;;  %4464 = vmatpush3.bf16.msra.mxu0 %v4463_v6  ;;  %v3952_v6 = vadd.s32 4294967208, %v4833_v46 }
 0x16a   :  { %v4177_v55 = vrot.slane %v3848_v37, %v5430_v38  ;;  %4466 = vmatprep.subr.bf16.mxu0 %v4465_v8 }
 0x16b   :  { %v3794_v49 = vpop.permute.xlu1 %3793  ;;  %v3955_v17 = vsub.s32 %v3952_v6, %v4587_v11 }
 0x16c   :  { %v4088_v51 = vrot.slane %v3794_v49, %v5356_v23  ;;  %v4178_v26 = vsel %vm3922_vm5, %v4177_v55, %v4173_v12  ;;  %v4279_v23 = vld [vmem:[%s5578_s2 + $0xf8] sm:$0xff]  ;;  %s4551_s2 = smov [#allocation7]  }
 0x16d   :  { %v4469_v62 = vpack.c.bf16 %v4279_v23, %v4278_v19  ;;  %4468 = vmatpush3.bf16.msra.mxu0 %v4467_v18  ;;  %s4394_s5 = sshll.u32 %s4551_s2, 4  ;;  %s4395_s5 = int_to_ptr.vmem [resolvable:$true] %s4394_s5 }
 0x16e   :  { %v4089_v20 = vsel %vm3908_vm3, %v4088_v51, %v4084_v48  ;;  %s4514_s6 = scalar_lea.vmem %s4395_s5, 32  ;;  %p4519_p9 = scmp.lt.s32.totalorder %s4395_s5, %s4395_s5 }
 0x16f   :  { %v3755_v14 = vpop.permute.xlu0 %3754  ;;  %4470 = vmatprep.subr.bf16.mxu0 %v4469_v62  ;;  %v3959_v62 = vadd.s32 4294967200, %v4833_v46  ;;  %p4515_p8 = scmp.ne.s32.totalorder %s4395_s5, %s4514_s6  ;;  %p4520_p10 = scmp.lt.s32.totalorder %s4514_s6, %s4514_s6 }
 0x170   :  { %v3701_v39 = vpop.permute.xlu1 %3700  ;;  %v4024_v5 = vrot.slane %v3755_v14, %v5472_v1 }
 0x171   :  { %v3914_v63 = vrot.slane %v3701_v39, %v5369_v2  ;;  %4472 = vmatpush3.bf16.msra.mxu0 %v4471_v21  ;;  %p4521_p11 = por %p4520_p10, %p4519_p9 }
 0x172   :  { %v4025_v31 = vsel %vm3929_vm6, %v4024_v5, %v4020_v54 }
 0x173   :  { %v3916_v33 = vsel %vm3915_vm4, %v3914_v63, %v3909_v24  ;;  %v3851_v52 = vpop.permute.xlu0 %3850  ;;  %p4522_p12 = pnand %p4521_p11, %p4515_p8 }
 0x174   :  { %v3797_v43 = vpop.permute.xlu1 %3796  ;;  %v4182_v3 = vrot.slane %v3851_v52, %v5472_v1 }
 0x175   :  { %v4093_v50 = vrot.slane %v3797_v43, %v5369_v2 }
 0x176   :  { %v4183_v7 = vsel %vm3929_vm6, %v4182_v3, %v4178_v26 }
 0x177   :  { %v4094_v0 = vsel %vm3915_vm4, %v4093_v50, %v4089_v20 }
 0x178   :  { %v3704_v29 = vpop.permute.xlu1 %3703 }
 0x179   :  { %v3921_v57 = vrot.slane %v3704_v29, %v5430_v38  ;;  %v3758_v25 = vpop.permute.xlu0 %3757 }
 0x17a   :  { %v4029_v36 = vrot.slane %v3758_v25, %v3934_v34 }
 0x17b   :  { %v3923_v12 = vsel %vm3922_vm5, %v3921_v57, %v3916_v33  ;;  %v3962_v33 = vsub.s32 %v3959_v62, %v4587_v11 }
 0x17c   :  { %v4030_v28 = vsel %vm3936_vm7, %v4029_v36, %v4025_v31 }
 0x17d   :  { %v3800_v2 = vpop.permute.xlu1 %3799 }
 0x17e   :  { %v4098_v48 = vrot.slane %v3800_v2, %v5430_v38  ;;  %v3854_v35 = vpop.permute.xlu0 %3853 }
 0x17f   :  { %v4187_v30 = vrot.slane %v3854_v35, %v3934_v34 }
 0x180   :  { %v4099_v22 = vsel %vm3922_vm5, %v4098_v48, %v4094_v0  ;;  %v3966_v0 = vadd.s32 4294967192, %v4833_v46 }
 0x181   :  { %v4188_v9 = vsel %vm3936_vm7, %v4187_v30, %v4183_v7 }
 0x182   :  { %v3707_v42 = vpop.permute.xlu1 %3706  ;;  %v3761_v45 = vpop.permute.xlu0 %3760  ;;  %v3969_v13 = vsub.s32 %v3966_v0, %v4587_v11 }
 0x183   :  { %v3928_v58 = vrot.slane %v3707_v42, %v5472_v1  ;;  %v4034_v56 = vrot.slane %v3761_v45, %v3941_v27 }
 0x185   :  { %v3930_v24 = vsel %vm3929_vm6, %v3928_v58, %v3923_v12  ;;  %v4035_v38 = vsel %vm3943_vm8, %v4034_v56, %v4030_v28 }
 0x186   :  { %v3803_v54 = vpop.permute.xlu1 %3802  ;;  %v3857_v60 = vpop.permute.xlu0 %3856 }
 0x187   :  { %v4103_v61 = vrot.slane %v3803_v54, %v5472_v1  ;;  %v4192_v15 = vrot.slane %v3857_v60, %v3941_v27 }
 0x189   :  { %v4104_v40 = vsel %vm3929_vm6, %v4103_v61, %v4099_v22  ;;  %v4193_v37 = vsel %vm3943_vm8, %v4192_v15, %v4188_v9  ;;  %v3973_v9 = vadd.s32 4294967184, %v4833_v46 }
 0x18a   :  { %v3764_v4 = vpop.permute.xlu0 %3763 }
 0x18b   :  { %v3710_v41 = vpop.permute.xlu1 %3709  ;;  %v4039_v55 = vrot.slane %v3764_v4, %v3948_v10 }
 0x18c   :  { %v3935_v49 = vrot.slane %v3710_v41, %v3934_v34 }
 0x18d   :  { %v4040_v51 = vsel %vm3950_vm9, %v4039_v55, %v4035_v38 }
 0x18e   :  { %v3937_v26 = vsel %vm3936_vm7, %v3935_v49, %v3930_v24  ;;  %v3976_v24 = vsub.s32 %v3973_v9, %v4587_v11 }
 0x18f   :  { %v3860_v8 = vpop.permute.xlu0 %3859 }
 0x190   :  { %v3806_v1 = vpop.permute.xlu1 %3805  ;;  %v4197_v59 = vrot.slane %v3860_v8, %v3948_v10 }
 0x191   :  { %v4108_v19 = vrot.slane %v3806_v1, %v3934_v34 }
 0x192   :  { %v4198_v23 = vsel %vm3950_vm9, %v4197_v59, %v4193_v37  ;;  %v3980_v37 = vadd.s32 4294967176, %v4833_v46 }
 0x193   :  { %v4109_v20 = vsel %vm3936_vm7, %v4108_v19, %v4104_v40  ;;  %v3767_v14 = vpop.permute.xlu0 %3766 }
 0x194   :  { %v3713_v18 = vpop.permute.xlu1 %3712  ;;  %v4044_v39 = vrot.slane %v3767_v14, %v3955_v17 }
 0x195   :  { %v3942_v5 = vrot.slane %v3713_v18, %v3941_v27 }
 0x196   :  { %v4045_v53 = vsel %vm3957_vm10, %v4044_v39, %v4040_v51  ;;  %v3983_v51 = vsub.s32 %v3980_v37, %v4587_v11 }
 0x197   :  { %v3944_v16 = vsel %vm3943_vm8, %v3942_v5, %v3937_v26 }
 0x198   :  { %v3863_v63 = vpop.permute.xlu0 %3862 }
 0x199   :  { %v3809_v31 = vpop.permute.xlu1 %3808  ;;  %v4202_v44 = vrot.slane %v3863_v63, %v3955_v17 }
 0x19a   :  { %v4113_v52 = vrot.slane %v3809_v31, %v3941_v27 }
 0x19b   :  { %v4203_v21 = vsel %vm3957_vm10, %v4202_v44, %v4198_v23 }
 0x19c   :  { %v4114_v43 = vsel %vm3943_vm8, %v4113_v52, %v4109_v20  ;;  %v3770_v3 = vpop.permute.xlu0 %3769 }
 0x19d   :  { %v3716_v50 = vpop.permute.xlu1 %3715  ;;  %v4049_v7 = vrot.slane %v3770_v3, %v3962_v33 }
 0x19e   :  { %v3949_v34 = vrot.slane %v3716_v50, %v3948_v10 }
 0x19f   :  { %v4050_v29 = vsel %vm3964_vm11, %v4049_v7, %v4045_v53 }
 0x1a0   :  { %v3951_v57 = vsel %vm3950_vm9, %v3949_v34, %v3944_v16 }
 0x1a1   :  { %v3866_v25 = vpop.permute.xlu0 %3865 }
 0x1a2   :  { %v3812_v36 = vpop.permute.xlu1 %3811  ;;  %v4207_v12 = vrot.slane %v3866_v25, %v3962_v33  ;;  %v547_v25 = vld [vmem:[#allocation2] sm:$0xf] }
 0x1a3   :  { %v4118_v28 = vrot.slane %v3812_v36, %v3948_v10 }
 0x1a4   :  { %v4208_v2 = vsel %vm3964_vm11, %v4207_v12, %v4203_v21 }
 0x1a5   :  { %v4119_v48 = vsel %vm3950_vm9, %v4118_v28, %v4114_v43  ;;  %v3773_v35 = vpop.permute.xlu0 %3772 }
 0x1a6   :  { %v3719_v30 = vpop.permute.xlu1 %3718  ;;  %v4054_v27 = vrot.slane %v3773_v35, %v3969_v13 }
 0x1a7   :  { %v3956_v22 = vrot.slane %v3719_v30, %v3955_v17 }
 0x1a8   :  { %v4055_v42 = vsel %vm3971_vm12, %v4054_v27, %v4050_v29 }
 0x1a9   :  { %v3958_v45 = vsel %vm3957_vm10, %v3956_v22, %v3951_v57 }
 0x1aa   :  { %v3869_v58 = vpop.permute.xlu0 %3868 }
 0x1ab   :  { %v3815_v56 = vpop.permute.xlu1 %3814  ;;  %v4212_v47 = vrot.slane %v3869_v58, %v3969_v13 }
 0x1ac   :  { %v4123_v38 = vrot.slane %v3815_v56, %v3955_v17 }
 0x1ad   :  { %v4213_v54 = vsel %vm3971_vm12, %v4212_v47, %v4208_v2 }
 0x1ae   :  { %v4124_v60 = vsel %vm3957_vm10, %v4123_v38, %v4119_v48  ;;  %v3776_v61 = vpop.permute.xlu0 %3775 }
 0x1af   :  { %v3722_v15 = vpop.permute.xlu1 %3721  ;;  %v4059_v10 = vrot.slane %v3776_v61, %v3976_v24 }
 0x1b0   :  { %v3963_v40 = vrot.slane %v3722_v15, %v3962_v33 }
 0x1b1   :  { %v4060_v4 = vsel %vm3978_vm13, %v4059_v10, %v4055_v42  ;;  %v4550_v42 = vmov 1966171168  }
 0x1b2   :  { %v3965_v41 = vsel %vm3964_vm11, %v3963_v40, %v3958_v45  ;;  %v4363_v45 = vunpack.c.l.s4 %v4550_v42 }
 0x1b3   :  { %v3872_v55 = vpop.permute.xlu0 %3871 }
 0x1b4   :  { %v3818_v49 = vpop.permute.xlu1 %3817  ;;  %v4217_v6 = vrot.slane %v3872_v55, %v3976_v24  ;;  %v4364_v58 = vunpack.c.0.s8 %v4363_v45 }
 0x1b5   :  { %v4128_v26 = vrot.slane %v3818_v49, %v3962_v33 }
 0x1b6   :  { %v4218_v8 = vsel %vm3978_vm13, %v4217_v6, %v4213_v54  ;;  %v4367_v47 = vsub.s32 %v4364_v58, %v4587_v11 }
 0x1b7   :  { %v4129_v1 = vsel %vm3964_vm11, %v4128_v26, %v4124_v60  ;;  %v3779_v59 = vpop.permute.xlu0 %3778 }
 0x1b8   :  { %v3725_v17 = vpop.permute.xlu1 %3724  ;;  %v4064_v19 = vrot.slane %v3779_v59, %v3983_v51 }
 0x1b9   :  { %v3970_v23 = vrot.slane %v3725_v17, %v3969_v13 }
 0x1ba   :  { %v4065_v46 = vsel %vm3985_vm14, %v4064_v19, %v4060_v4 }
 0x1bb   :  { %v3972_v20 = vsel %vm3971_vm12, %v3970_v23, %v3965_v41  ;;  %v3875_v14 = vpop.permute.xlu0 %3874 }
 0x1bc   :  { %v3821_v18 = vpop.permute.xlu1 %3820  ;;  %v4222_v39 = vrot.slane %v3875_v14, %v3983_v51 }
 0x1bd   :  { %v4133_v5 = vrot.slane %v3821_v18, %v3969_v13 }
 0x1be   :  { %v4223_v62 = vsel %vm3985_vm14, %v4222_v39, %v4218_v8 }
 0x1bf   :  { %v4134_v53 = vsel %vm3971_vm12, %v4133_v5, %v4129_v1  ;;  %v4226_v16 = vsel %vm4224_vm15, %v4223_v62, %v4065_v46 }
 0x1c0   :  { %v3728_v63 = vpop.permute.xlu1 %3727 }
 0x1c1   :  { %v3977_v31 = vrot.slane %v3728_v63, %v3976_v24 }
 0x1c3   :  { %v3979_v44 = vsel %vm3978_vm13, %v3977_v31, %v3972_v20 }
 0x1c4   :  { %v3824_v33 = vpop.permute.xlu1 %3823 }
 0x1c5   :  { %v4138_v52 = vrot.slane %v3824_v33, %v3976_v24 }
 0x1c7   :  { %v4139_v21 = vsel %vm3978_vm13, %v4138_v52, %v4134_v53 }
 0x1c8   :  { %v3731_v43 = vpop.permute.xlu1 %3730 }
 0x1c9   :  { %v3984_v3 = vrot.slane %v3731_v43, %v3983_v51 }
 0x1cb   :  { %v3986_v50 = vsel %vm3985_vm14, %v3984_v3, %v3979_v44 }
 0x1cc   :  { %v3827_v7 = vpop.permute.xlu1 %3826 }
 0x1cd   :  { %v4143_v34 = vrot.slane %v3827_v7, %v3983_v51 }
 0x1cf   :  { %v4144_v0 = vsel %vm3985_vm14, %v4143_v34, %v4139_v21 }
 0x1d0   :  { %v4225_v29 = vsel %vm4224_vm15, %v4144_v0, %v3986_v50 }
 0x1d1   :  { %v4227_v57 = vcombine.low %v4225_v29, %v4226_v16 }
 0x1d3   :  { %v4234_v36 = vrot.slane %v4227_v57, %v4610_v32 }
 0x1d5   :  { %v4236_v12 = vadd.f32 %v4234_v36, %v547_v25 }
 0x1d7   :  { %4237 = vst [vmem:[#allocation2] sm:$0xf] %v4236_v12 }
 0x1de   :  { %v4241_v13 = vld [vmem:[#allocation2] sm:$0xf] }
 0x1df   :  { %v4242_v28 = vmul.f32 0.00390625, %v4241_v13 }
 0x1e1   :  { %4488 = vlog2.f32 %v4242_v28 }
 0x1eb   :  { %v4489_v2 = vpop.eup %4488 }
 0x1ec   :  { %v4244_v48 = vmul.f32 0.6931472, %v4489_v2 }
 0x1ee   :  { %v4245_v35 = vmul.f32 0.33333334, %v4244_v48 }
 0x1f0   :  { %v4246_v30 = vmul.f32 1.442695, %v4245_v35 }
 0x1f2   :  { %4490 = vpow2.f32 %v4246_v30 }
 0x1fc   :  { %v4491_v27 = vpop.eup %4490 }
 0x1fd   :  { %v4287_v22 = vrot.slane %v4491_v27, %v4610_v32 }
 0x1ff   :  { %v4288_v9 = vcombine.high %v4287_v22, %v4287_v22 }
 0x201   :  { %4355 = vmatprep.mubr.f32.mxu0 %v4288_v9 }
 0x202   :  { %4356 = vmatmul.mubr.f32.vlgmr.msra.gmra.mrb[0].mxu0 %v4287_v22 }
 0x2d5   :  { %v4438_v56 = vpop.f32.mrb[0].mxu0 }
 0x2d6   :  { %v4439_v24 = vpop.f32.mrb[1].mxu0 }
 0x2d7   :  { %v4440_v38 = vadd.f32 %v4439_v24, %v4438_v56 }
 0x2d9   :  { %v4368_v54 = vrot.slane %v4440_v38, %v4367_v47 }
 0x2db   :  { %v4369_v60 = vcombine.high %v4368_v54, %v4368_v54  ;;  %v4376_v61 = vrot.slane %v4368_v54, %v4367_v47 }
 0x2dd   :  { %v4383_v15 = vrot.slane %v4369_v60, %v4367_v47  ;;  %4387 = vst.msk [vmem:[#allocation7] sm:$0x1] %vm4386_vm0, %v4376_v61 }
 0x2df   :  { %4388 = vst.msk [vmem:[#allocation7 + $0x1] sm:$0x1] %vm4386_vm0, %v4383_v15 }
 0x2e0   :  { %4525 = shalt.err (!%p4522_p12)
}
 0x2e1   :  { %s4526_s9 = scalar_lea.hbm %s5579_s3, 32 }
 0x2e2   :  { %p4527_p13 = scmp.ne.s32.totalorder %s5579_s3, %s4526_s9  ;;  %p4530_p0 = scmp.lt.u32.totalorder %s4526_s9, %s5579_s3 }
 0x2e4   :  { %p4532_p1 = pnand %p4530_p0, %p4527_p13 }
 0x2e6   :  { %4535 = shalt.err (!%p4532_p1)
}
 0x2e7   :  { %s4552_s14 = smov 1  }
 0x2e8   :  { %4400 = dma.vmem_to_hbm [thread:$0]  %s4395_s5, 32, %s5579_s3, [#allocation6], %s4542_s22, %s4542_s22, %s4552_s14  }
 0x2e9   :  { %4538 = dma.done.wait [#allocation6], 32  }
 0x2ea   :  { %4539 = vsyncadd [#allocation6], 4294967264 }
 0x2eb   :  { %4404 = vsyncpa [#allocation5], 1 }
 0x2ec   :  { %4405 = vsyncpa [#allocation6], 1 }

</bundles_post_ra>
